<compile_context>
chip_gen: v6e
topology: v6e:2x2x1
jax: 0.10.0
libtpu: 0.0.40
codegen_flags: <defaults>
</compile_context>

<pallas_src>
import jax
import jax.numpy as jnp
from jax.experimental import pallas as pl
from jax.experimental.pallas import tpu as pltpu

# ----------------------------- configuration (small, synthetic) -----------------------------
B = 2           # batch
S = 8           # sequence length
H = 32          # hidden_size (== out_size, required by the residual)
FFN = 64        # ffn_size
HEADS = 4       # head_size (number of heads, in this module's naming)
DK = H // HEADS
SCALE = DK ** (-0.5)
LN_EPS = 1e-5
VROW = 2 * H + FFN          # = 128, row where the packed vector block starts in the W slab
W_ROWS = VROW + 4           # = 132 total rows in the weight slab
OUT_ROWS = B * S + B * HEADS    # = 24
OUT_COLS = 2 * S * S            # = 128 (lane-dense output slab)


# --------------------------------------- Pallas kernel --------------------------------------
def encoder_layer_kernel(x_ref, mask_ref, w_ref, out_ref):
    x = x_ref[...]            # (B*S, H)   f32
    mask = mask_ref[...]      # (B, S)     f32 0/1

    # ----- unpack the fused weight slab with static slices (no per-call packing cost) -----
    w_qkv = w_ref[0:H, 0:3 * H]              # (H, 3H)  [Wq | Wk | Wv]
    w_o = w_ref[0:H, 3 * H:4 * H]            # (H, H)
    w1 = w_ref[H:2 * H, 0:FFN]               # (H, FFN)
    w2 = w_ref[2 * H:2 * H + FFN, 0:H]       # (FFN, H)
    vec = w_ref[VROW:VROW + 4, :]            # (4, 128) packed small vectors

    ln1_w = vec[0:1, 0:H]
    ln1_b = vec[0:1, H:2 * H]
    ln2_w = vec[0:1, 2 * H:3 * H]
    ln2_b = vec[0:1, 3 * H:4 * H]
    b_qkv = vec[1:2, 0:3 * H]                # (1, 3H) = [bq | bk | bv]
    b_o = vec[1:2, 3 * H:4 * H]              # (1, H)
    b1 = vec[2:3, 0:FFN]                     # (1, FFN)
    b2 = vec[3:4, 0:H]                       # (1, H)

    # ----- self_attention_norm (LayerNorm over hidden dim, all B*S rows at once) -----
    mu = jnp.mean(x, axis=-1, keepdims=True)
    var = jnp.mean((x - mu) * (x - mu), axis=-1, keepdims=True)
    y = (x - mu) * jax.lax.rsqrt(var + LN_EPS) * ln1_w + ln1_b          # (B*S, H)

    # ----- fused q/k/v projection: one MXU pass, no dead Wo columns -----
    qkv = jnp.dot(y, w_qkv, preferred_element_type=jnp.float32) + b_qkv  # (B*S, 3H)

    # single head-split relayout for q, k and v of both batches:
    # (B*S, 3H) -> (B*S, 3*HEADS, DK) -> (3*HEADS, B*S, DK)
    t = qkv.reshape(B * S, 3 * HEADS, DK).transpose(1, 0, 2)

    ctx_parts = []
    for b in range(B):                       # B is tiny & static -> unrolled
        r0 = b * S
        qb = t[0:HEADS, r0:r0 + S, :]                    # (HEADS, S, DK)
        kb = t[HEADS:2 * HEADS, r0:r0 + S, :]
        vb = t[2 * HEADS:3 * HEADS, r0:r0 + S, :]

        m = mask[b:b + 1, :]                              # (1, S)
        mm = m.T * m                                      # (S, S): m[q] * m[k]
        bias = (mm - 1.0) * 1e9                           # 0 valid / -1e9 masked (additive)

        s = jnp.einsum('hqd,hkd->hqk', qb, kb,
                       preferred_element_type=jnp.float32) * SCALE       # (HEADS, S, S)
        att_score_b = s + bias[None, :, :]

        # masked_softmax: softmax -> re-mask -> renormalize by (sum + 1e-13)
        p = jax.nn.softmax(att_score_b, axis=-1) * mm[None, :, :]
        p = p / (jnp.sum(p, axis=-1, keepdims=True) + 1e-13)             # att_map

        # lane-flattened stores straight into the packed output slab (1 writeback DMA)
        rr = B * S + b * HEADS
        out_ref[rr:rr + HEADS, 0:S * S] = att_score_b.reshape(HEADS, S * S).astype(out_ref.dtype)
        out_ref[rr:rr + HEADS, S * S:2 * S * S] = p.reshape(HEADS, S * S).astype(out_ref.dtype)

        ctx_parts.append(jnp.einsum('hqk,hkd->hqd', p, vb,
                                    preferred_element_type=jnp.float32))  # (HEADS, S, DK)

    # merge heads back with one sublane concat + one transpose + trailing reshape
    ctx = jnp.concatenate(ctx_parts, axis=1)              # (HEADS, B*S, DK)
    ctx = ctx.transpose(1, 0, 2).reshape(B * S, H)        # (B*S, H)

    attn_out = jnp.dot(ctx, w_o, preferred_element_type=jnp.float32) + b_o

    # residual 1 (dropouts are identity in eval mode)
    x1 = x + attn_out

    # ----- ffn_norm + FeedForwardNetwork -----
    mu2 = jnp.mean(x1, axis=-1, keepdims=True)
    var2 = jnp.mean((x1 - mu2) * (x1 - mu2), axis=-1, keepdims=True)
    y2 = (x1 - mu2) * jax.lax.rsqrt(var2 + LN_EPS) * ln2_w + ln2_b

    h1 = jnp.maximum(jnp.dot(y2, w1, preferred_element_type=jnp.float32) + b1, 0.0)
    ffn_out = jnp.dot(h1, w2, preferred_element_type=jnp.float32) + b2

    # residual 2 -> rows 0:B*S of the output slab (lanes H:128 are unused padding)
    out_ref[0:B * S, 0:H] = (x1 + ffn_out).astype(out_ref.dtype)


# ------------------------------------------ wrapper ------------------------------------------
def pack_params(params):
    """Pack all weights / LN params / biases into one (132, 128) slab.

    Call ONCE at init time; the packed slab is reused by every encoder_layer call,
    so none of these concatenates sit on the per-call path.
    """
    (ln1_w, ln1_b, wq, bq, wk, bk, wv, bv, wo, bo,
     ln2_w, ln2_b, w1, b1, w2, b2) = params
    f32 = jnp.float32
    wqkvo = jnp.concatenate([wq, wk, wv, wo], axis=1)                            # (H, 4H)
    w1p = jnp.concatenate([w1, jnp.zeros((H, 4 * H - FFN), f32)], axis=1)        # (H, 128)
    w2p = jnp.concatenate([w2, jnp.zeros((FFN, 4 * H - H), f32)], axis=1)        # (FFN, 128)
    row0 = jnp.concatenate([ln1_w, ln1_b, ln2_w, ln2_b], axis=1)                 # (1, 128)
    row1 = jnp.concatenate([bq, bk, bv, bo], axis=1)                             # (1, 128)
    row2 = jnp.concatenate([b1, jnp.zeros((1, 4 * H - FFN), f32)], axis=1)       # (1, 128)
    row3 = jnp.concatenate([b2, jnp.zeros((1, 4 * H - H), f32)], axis=1)         # (1, 128)
    return jnp.concatenate([wqkvo, w1p, w2p, row0, row1, row2, row3], axis=0)    # (132, 128)


@jax.jit
def encoder_layer(x, mask, w_slab):
    x2d = x.reshape(B * S, H)
    mask2d = mask.reshape(B, S)            # lane-friendly mask layout

    # Single invocation (no grid): the whole problem (<100 KiB) lives in VMEM at once.
    # 3 input DMAs (x, mask, weight slab) + 1 output DMA (packed (24,128) slab).
    vmem_spec = pl.BlockSpec(memory_space=pltpu.MemorySpace.VMEM)
    slab = pl.pallas_call(
        encoder_layer_kernel,
        out_shape=jax.ShapeDtypeStruct((OUT_ROWS, OUT_COLS), jnp.float32),
        in_specs=[vmem_spec, vmem_spec, vmem_spec],
        out_specs=vmem_spec,
    )(x2d, mask2d, w_slab)

    out = slab[0:B * S, 0:H].reshape(B, S, H)
    att_score = slab[B * S:, 0:S * S].reshape(B, HEADS, S, S)
    att_map = slab[B * S:, S * S:2 * S * S].reshape(B, HEADS, S, S)
    return out, att_score, att_map


# -------------------------------- pure-JAX reference (for check) ----------------------------
def encoder_layer_ref(x, mask, params):
    (ln1_w, ln1_b, wq, bq, wk, bk, wv, bv, wo, bo,
     ln2_w, ln2_b, w1, b1, w2, b2) = params

    def ln(z, w, b):
        mu = jnp.mean(z, axis=-1, keepdims=True)
        var = jnp.mean((z - mu) ** 2, axis=-1, keepdims=True)
        return (z - mu) * jax.lax.rsqrt(var + LN_EPS) * w[0] + b[0]

    y = ln(x, ln1_w, ln1_b)
    q = (y @ wq + bq[0]).reshape(B, S, HEADS, DK).transpose(0, 2, 1, 3)
    k = (y @ wk + bk[0]).reshape(B, S, HEADS, DK).transpose(0, 2, 1, 3)
    v = (y @ wv + bv[0]).reshape(B, S, HEADS, DK).transpose(0, 2, 1, 3)
    scores = jnp.einsum('bhqd,bhkd->bhqk', q, k) * SCALE
    mask2 = mask[:, None, :, :] * mask[:, None, :, :].transpose(0, 1, 3, 2)  # (B,1,S,S)
    mask4 = jnp.broadcast_to(mask2, (B, HEADS, S, S))
    att_score = jnp.where(mask4 == 0.0, -1e9, scores)
    p = jax.nn.softmax(att_score, axis=-1) * mask4
    p = p / (jnp.sum(p, axis=-1, keepdims=True) + 1e-13)
    ctx = jnp.einsum('bhqk,bhkd->bhqd', p, v).transpose(0, 2, 1, 3).reshape(B, S, H)
    x1 = x + (ctx @ wo + bo[0])
    y2 = ln(x1, ln2_w, ln2_b)
    ffn = jnp.maximum(y2 @ w1 + b1[0], 0.0) @ w2 + b2[0]
    return x1 + ffn, att_score, p


# --------------------------------------------- main -----------------------------------------
if __name__ == "__main__":
    key = jax.random.PRNGKey(0)
    keys = jax.random.split(key, 12)

    x = jax.random.normal(keys[0], (B, S, H), dtype=jnp.float32)

    # per-token validity mask (B, S, 1): batch 0 has 6 valid tokens, batch 1 has 8
    lengths = jnp.array([6, 8])
    mask = (jnp.arange(S)[None, :] < lengths[:, None]).astype(jnp.float32)[:, :, None]

    def lin(k, shape):
        return 0.05 * jax.random.normal(k, shape, dtype=jnp.float32)

    params = (
        jnp.ones((1, H), jnp.float32), jnp.zeros((1, H), jnp.float32),    # ln1 w, b
        lin(keys[1], (H, H)), lin(keys[2], (1, H)),                        # wq, bq
        lin(keys[3], (H, H)), lin(keys[4], (1, H)),                        # wk, bk
        lin(keys[5], (H, H)), lin(keys[6], (1, H)),                        # wv, bv
        lin(keys[7], (H, H)), lin(keys[8], (1, H)),                        # wo, bo
        jnp.ones((1, H), jnp.float32), jnp.zeros((1, H), jnp.float32),    # ln2 w, b
        lin(keys[9], (H, FFN)), lin(keys[10], (1, FFN)),                   # ffn layer1
        lin(keys[11], (FFN, H)), jnp.zeros((1, H), jnp.float32),           # ffn layer2
    )

    # Pack parameters ONCE (init-time); per-call path only reshapes x / mask.
    w_slab = jax.block_until_ready(pack_params(params))

    out, att_score, att_map = jax.block_until_ready(encoder_layer(x, mask, w_slab))

    ref_out, ref_score, ref_map = encoder_layer_ref(x, mask, params)
    assert jnp.allclose(out, ref_out, atol=1e-4, rtol=1e-4)
    assert jnp.allclose(att_score, ref_score, atol=1e-3, rtol=1e-4)
    assert jnp.allclose(att_map, ref_map, atol=1e-5, rtol=1e-4)

    print("KERNEL_OK")
</pallas_src>

<mosaic_0001>
module attributes {stable_mosaic.version = 11 : i64} {
  func.func @encoder_layer_kernel(%arg0: memref<16x32xf32, #tpu.memory_space<vmem>>, %arg1: memref<2x8xf32, #tpu.memory_space<vmem>>, %arg2: memref<132x128xf32, #tpu.memory_space<vmem>>, %arg3: memref<24x128xf32, #tpu.memory_space<vmem>>) attributes {dimension_semantics = [], scalar_prefetch = 0 : i64, scratch_operands = 0 : i64, tpu.core_type = #tpu.core_type<tc>} {
    %c0 = arith.constant 0 : index
    %c0_0 = arith.constant 0 : index
    %0 = vector.load %arg0[%c0, %c0_0] : memref<16x32xf32, #tpu.memory_space<vmem>>, vector<16x32xf32>
    %c0_1 = arith.constant 0 : index
    %c0_2 = arith.constant 0 : index
    %1 = vector.load %arg1[%c0_1, %c0_2] : memref<2x8xf32, #tpu.memory_space<vmem>>, vector<2x8xf32>
    %c0_3 = arith.constant 0 : index
    %c0_4 = arith.constant 0 : index
    %2 = vector.load %arg2[%c0_3, %c0_4] : memref<132x128xf32, #tpu.memory_space<vmem>>, vector<32x96xf32>
    %c0_5 = arith.constant 0 : index
    %c96 = arith.constant 96 : index
    %3 = vector.load %arg2[%c0_5, %c96] : memref<132x128xf32, #tpu.memory_space<vmem>>, vector<32x32xf32>
    %c32 = arith.constant 32 : index
    %c0_6 = arith.constant 0 : index
    %4 = vector.load %arg2[%c32, %c0_6] : memref<132x128xf32, #tpu.memory_space<vmem>>, vector<32x64xf32>
    %c64 = arith.constant 64 : index
    %c0_7 = arith.constant 0 : index
    %5 = vector.load %arg2[%c64, %c0_7] : memref<132x128xf32, #tpu.memory_space<vmem>>, vector<64x32xf32>
    %c128 = arith.constant 128 : index
    %c0_8 = arith.constant 0 : index
    %6 = vector.load %arg2[%c128, %c0_8] : memref<132x128xf32, #tpu.memory_space<vmem>>, vector<4x128xf32>
    %7 = vector.extract_strided_slice %6 {offsets = [0, 0], sizes = [1, 32], strides = [1, 1]} : vector<4x128xf32> to vector<1x32xf32>
    %8 = vector.extract_strided_slice %6 {offsets = [0, 32], sizes = [1, 32], strides = [1, 1]} : vector<4x128xf32> to vector<1x32xf32>
    %9 = vector.extract_strided_slice %6 {offsets = [0, 64], sizes = [1, 32], strides = [1, 1]} : vector<4x128xf32> to vector<1x32xf32>
    %10 = vector.extract_strided_slice %6 {offsets = [0, 96], sizes = [1, 32], strides = [1, 1]} : vector<4x128xf32> to vector<1x32xf32>
    %11 = vector.extract_strided_slice %6 {offsets = [1, 0], sizes = [1, 96], strides = [1, 1]} : vector<4x128xf32> to vector<1x96xf32>
    %12 = vector.extract_strided_slice %6 {offsets = [1, 96], sizes = [1, 32], strides = [1, 1]} : vector<4x128xf32> to vector<1x32xf32>
    %13 = vector.extract_strided_slice %6 {offsets = [2, 0], sizes = [1, 64], strides = [1, 1]} : vector<4x128xf32> to vector<1x64xf32>
    %14 = vector.extract_strided_slice %6 {offsets = [3, 0], sizes = [1, 32], strides = [1, 1]} : vector<4x128xf32> to vector<1x32xf32>
    %cst = arith.constant dense<0.000000e+00> : vector<16xf32>
    %15 = vector.multi_reduction <add>, %0, %cst [1] : vector<16x32xf32> to vector<16xf32>
    %16 = vector.shape_cast %15 : vector<16xf32> to vector<16x1xf32>
    %cst_9 = arith.constant 3.200000e+01 : f32
    %17 = vector.broadcast %cst_9 : f32 to vector<16x1xf32>
    %18 = arith.divf %16, %17 : vector<16x1xf32>
    %19 = vector.broadcast %18 : vector<16x1xf32> to vector<16x32xf32>
    %20 = arith.subf %0, %19 : vector<16x32xf32>
    %21 = vector.broadcast %18 : vector<16x1xf32> to vector<16x32xf32>
    %22 = arith.subf %0, %21 : vector<16x32xf32>
    %23 = arith.mulf %20, %22 : vector<16x32xf32>
    %cst_10 = arith.constant dense<0.000000e+00> : vector<16xf32>
    %24 = vector.multi_reduction <add>, %23, %cst_10 [1] : vector<16x32xf32> to vector<16xf32>
    %25 = vector.shape_cast %24 : vector<16xf32> to vector<16x1xf32>
    %cst_11 = arith.constant 3.200000e+01 : f32
    %26 = vector.broadcast %cst_11 : f32 to vector<16x1xf32>
    %27 = arith.divf %25, %26 : vector<16x1xf32>
    %28 = vector.broadcast %18 : vector<16x1xf32> to vector<16x32xf32>
    %29 = arith.subf %0, %28 : vector<16x32xf32>
    %cst_12 = arith.constant 9.99999974E-6 : f32
    %30 = vector.broadcast %cst_12 : f32 to vector<16x1xf32>
    %31 = arith.addf %27, %30 : vector<16x1xf32>
    %32 = math.rsqrt %31 : vector<16x1xf32>
    %33 = vector.broadcast %32 : vector<16x1xf32> to vector<16x32xf32>
    %34 = arith.mulf %29, %33 : vector<16x32xf32>
    %35 = vector.broadcast %7 : vector<1x32xf32> to vector<16x32xf32>
    %36 = arith.mulf %34, %35 : vector<16x32xf32>
    %37 = vector.broadcast %8 : vector<1x32xf32> to vector<16x32xf32>
    %38 = arith.addf %36, %37 : vector<16x32xf32>
    %cst_13 = arith.constant dense<0.000000e+00> : vector<16x96xf32>
    %39 = tpu.matmul %38, %2, %cst_13 {dimension_numbers = #tpu.dot_dimension_numbers<[1], [0], [0], [1], [0, 0, 1, 1], [], []>} : vector<16x32xf32>, vector<32x96xf32>, vector<16x96xf32> -> vector<16x96xf32>
    %40 = vector.broadcast %11 : vector<1x96xf32> to vector<16x96xf32>
    %41 = arith.addf %39, %40 : vector<16x96xf32>
    %42 = vector.shape_cast %41 : vector<16x96xf32> to vector<16x12x8xf32>
    %43 = tpu.transpose %42, [1, 0, 2] : vector<16x12x8xf32> -> vector<12x16x8xf32>
    %44 = vector.extract_strided_slice %43 {offsets = [0, 0, 0], sizes = [4, 8, 8], strides = [1, 1, 1]} : vector<12x16x8xf32> to vector<4x8x8xf32>
    %45 = vector.extract_strided_slice %43 {offsets = [4, 0, 0], sizes = [4, 8, 8], strides = [1, 1, 1]} : vector<12x16x8xf32> to vector<4x8x8xf32>
    %46 = vector.extract_strided_slice %43 {offsets = [8, 0, 0], sizes = [4, 8, 8], strides = [1, 1, 1]} : vector<12x16x8xf32> to vector<4x8x8xf32>
    %47 = vector.extract_strided_slice %1 {offsets = [0, 0], sizes = [1, 8], strides = [1, 1]} : vector<2x8xf32> to vector<1x8xf32>
    %48 = tpu.transpose %47, [1, 0] : vector<1x8xf32> -> vector<8x1xf32>
    %49 = vector.broadcast %48 : vector<8x1xf32> to vector<8x8xf32>
    %50 = vector.broadcast %47 : vector<1x8xf32> to vector<8x8xf32>
    %51 = arith.mulf %49, %50 : vector<8x8xf32>
    %cst_14 = arith.constant 1.000000e+00 : f32
    %52 = vector.broadcast %cst_14 : f32 to vector<8x8xf32>
    %53 = arith.subf %51, %52 : vector<8x8xf32>
    %cst_15 = arith.constant 1.000000e+09 : f32
    %54 = vector.broadcast %cst_15 : f32 to vector<8x8xf32>
    %55 = arith.mulf %53, %54 : vector<8x8xf32>
    "tpu.trace_start"() <{level = 10 : i32, message = "hqd,hkd->hqk"}> : () -> ()
    %cst_16 = arith.constant dense<0.000000e+00> : vector<4x8x8xf32>
    %56 = tpu.matmul %44, %45, %cst_16 {dimension_numbers = #tpu.dot_dimension_numbers<[2], [2], [1], [1], [0, 0, 0, 1, 1, 1], [0], [0]>} : vector<4x8x8xf32>, vector<4x8x8xf32>, vector<4x8x8xf32> -> vector<4x8x8xf32>
    "tpu.trace_stop"() : () -> ()
    %cst_17 = arith.constant 0.353553385 : f32
    %57 = vector.broadcast %cst_17 : f32 to vector<4x8x8xf32>
    %58 = arith.mulf %56, %57 : vector<4x8x8xf32>
    %59 = vector.shape_cast %55 : vector<8x8xf32> to vector<1x8x8xf32>
    %60 = vector.broadcast %59 : vector<1x8x8xf32> to vector<4x8x8xf32>
    %61 = arith.addf %58, %60 : vector<4x8x8xf32>
    %cst_18 = arith.constant dense<0xFF800000> : vector<4x8xf32>
    %62 = vector.multi_reduction <maximumf>, %61, %cst_18 [2] : vector<4x8x8xf32> to vector<4x8xf32>
    %cst_19 = arith.constant 0xFF800000 : f32
    %63 = vector.broadcast %cst_19 : f32 to vector<4x8xf32>
    %64 = arith.maximumf %63, %62 : vector<4x8xf32>
    %65 = vector.shape_cast %64 : vector<4x8xf32> to vector<4x8x1xf32>
    %66 = vector.broadcast %65 : vector<4x8x1xf32> to vector<4x8x8xf32>
    %67 = arith.subf %61, %66 : vector<4x8x8xf32>
    %68 = math.exp %67 : vector<4x8x8xf32>
    %cst_20 = arith.constant dense<0.000000e+00> : vector<4x8xf32>
    %69 = vector.multi_reduction <add>, %68, %cst_20 [2] : vector<4x8x8xf32> to vector<4x8xf32>
    %70 = vector.shape_cast %69 : vector<4x8xf32> to vector<4x8x1xf32>
    %71 = vector.broadcast %70 : vector<4x8x1xf32> to vector<4x8x8xf32>
    %72 = arith.divf %68, %71 : vector<4x8x8xf32>
    %73 = vector.shape_cast %51 : vector<8x8xf32> to vector<1x8x8xf32>
    %74 = vector.broadcast %73 : vector<1x8x8xf32> to vector<4x8x8xf32>
    %75 = arith.mulf %72, %74 : vector<4x8x8xf32>
    %cst_21 = arith.constant dense<0.000000e+00> : vector<4x8xf32>
    %76 = vector.multi_reduction <add>, %75, %cst_21 [2] : vector<4x8x8xf32> to vector<4x8xf32>
    %77 = vector.shape_cast %76 : vector<4x8xf32> to vector<4x8x1xf32>
    %cst_22 = arith.constant 9.99999982E-14 : f32
    %78 = vector.broadcast %cst_22 : f32 to vector<4x8x1xf32>
    %79 = arith.addf %77, %78 : vector<4x8x1xf32>
    %80 = vector.broadcast %79 : vector<4x8x1xf32> to vector<4x8x8xf32>
    %81 = arith.divf %75, %80 : vector<4x8x8xf32>
    %82 = vector.shape_cast %61 : vector<4x8x8xf32> to vector<4x64xf32>
    %c16 = arith.constant 16 : index
    %c0_23 = arith.constant 0 : index
    %83 = vector.load %arg3[%c16, %c0_23] : memref<24x128xf32, #tpu.memory_space<vmem>>, vector<4x64xf32>
    tpu.vector_store %arg3[%c16, %c0_23], %82 {strides = array<i32>} : memref<24x128xf32, #tpu.memory_space<vmem>>, vector<4x64xf32>,
    %84 = vector.shape_cast %81 : vector<4x8x8xf32> to vector<4x64xf32>
    %c16_24 = arith.constant 16 : index
    %c64_25 = arith.constant 64 : index
    %85 = vector.load %arg3[%c16_24, %c64_25] : memref<24x128xf32, #tpu.memory_space<vmem>>, vector<4x64xf32>
    tpu.vector_store %arg3[%c16_24, %c64_25], %84 {strides = array<i32>} : memref<24x128xf32, #tpu.memory_space<vmem>>, vector<4x64xf32>,
    "tpu.trace_start"() <{level = 10 : i32, message = "hqk,hkd->hqd"}> : () -> ()
    %cst_26 = arith.constant dense<0.000000e+00> : vector<4x8x8xf32>
    %86 = tpu.matmul %81, %46, %cst_26 {dimension_numbers = #tpu.dot_dimension_numbers<[2], [1], [1], [2], [0, 0, 0, 1, 1, 2], [0], [0]>} : vector<4x8x8xf32>, vector<4x8x8xf32>, vector<4x8x8xf32> -> vector<4x8x8xf32>
    "tpu.trace_stop"() : () -> ()
    %87 = vector.extract_strided_slice %43 {offsets = [0, 8, 0], sizes = [4, 8, 8], strides = [1, 1, 1]} : vector<12x16x8xf32> to vector<4x8x8xf32>
    %88 = vector.extract_strided_slice %43 {offsets = [4, 8, 0], sizes = [4, 8, 8], strides = [1, 1, 1]} : vector<12x16x8xf32> to vector<4x8x8xf32>
    %89 = vector.extract_strided_slice %43 {offsets = [8, 8, 0], sizes = [4, 8, 8], strides = [1, 1, 1]} : vector<12x16x8xf32> to vector<4x8x8xf32>
    %90 = vector.extract_strided_slice %1 {offsets = [1, 0], sizes = [1, 8], strides = [1, 1]} : vector<2x8xf32> to vector<1x8xf32>
    %91 = tpu.transpose %90, [1, 0] : vector<1x8xf32> -> vector<8x1xf32>
    %92 = vector.broadcast %91 : vector<8x1xf32> to vector<8x8xf32>
    %93 = vector.broadcast %90 : vector<1x8xf32> to vector<8x8xf32>
    %94 = arith.mulf %92, %93 : vector<8x8xf32>
    %cst_27 = arith.constant 1.000000e+00 : f32
    %95 = vector.broadcast %cst_27 : f32 to vector<8x8xf32>
    %96 = arith.subf %94, %95 : vector<8x8xf32>
    %cst_28 = arith.constant 1.000000e+09 : f32
    %97 = vector.broadcast %cst_28 : f32 to vector<8x8xf32>
    %98 = arith.mulf %96, %97 : vector<8x8xf32>
    "tpu.trace_start"() <{level = 10 : i32, message = "hqd,hkd->hqk"}> : () -> ()
    %cst_29 = arith.constant dense<0.000000e+00> : vector<4x8x8xf32>
    %99 = tpu.matmul %87, %88, %cst_29 {dimension_numbers = #tpu.dot_dimension_numbers<[2], [2], [1], [1], [0, 0, 0, 1, 1, 1], [0], [0]>} : vector<4x8x8xf32>, vector<4x8x8xf32>, vector<4x8x8xf32> -> vector<4x8x8xf32>
    "tpu.trace_stop"() : () -> ()
    %cst_30 = arith.constant 0.353553385 : f32
    %100 = vector.broadcast %cst_30 : f32 to vector<4x8x8xf32>
    %101 = arith.mulf %99, %100 : vector<4x8x8xf32>
    %102 = vector.shape_cast %98 : vector<8x8xf32> to vector<1x8x8xf32>
    %103 = vector.broadcast %102 : vector<1x8x8xf32> to vector<4x8x8xf32>
    %104 = arith.addf %101, %103 : vector<4x8x8xf32>
    %cst_31 = arith.constant dense<0xFF800000> : vector<4x8xf32>
    %105 = vector.multi_reduction <maximumf>, %104, %cst_31 [2] : vector<4x8x8xf32> to vector<4x8xf32>
    %cst_32 = arith.constant 0xFF800000 : f32
    %106 = vector.broadcast %cst_32 : f32 to vector<4x8xf32>
    %107 = arith.maximumf %106, %105 : vector<4x8xf32>
    %108 = vector.shape_cast %107 : vector<4x8xf32> to vector<4x8x1xf32>
    %109 = vector.broadcast %108 : vector<4x8x1xf32> to vector<4x8x8xf32>
    %110 = arith.subf %104, %109 : vector<4x8x8xf32>
    %111 = math.exp %110 : vector<4x8x8xf32>
    %cst_33 = arith.constant dense<0.000000e+00> : vector<4x8xf32>
    %112 = vector.multi_reduction <add>, %111, %cst_33 [2] : vector<4x8x8xf32> to vector<4x8xf32>
    %113 = vector.shape_cast %112 : vector<4x8xf32> to vector<4x8x1xf32>
    %114 = vector.broadcast %113 : vector<4x8x1xf32> to vector<4x8x8xf32>
    %115 = arith.divf %111, %114 : vector<4x8x8xf32>
    %116 = vector.shape_cast %94 : vector<8x8xf32> to vector<1x8x8xf32>
    %117 = vector.broadcast %116 : vector<1x8x8xf32> to vector<4x8x8xf32>
    %118 = arith.mulf %115, %117 : vector<4x8x8xf32>
    %cst_34 = arith.constant dense<0.000000e+00> : vector<4x8xf32>
    %119 = vector.multi_reduction <add>, %118, %cst_34 [2] : vector<4x8x8xf32> to vector<4x8xf32>
    %120 = vector.shape_cast %119 : vector<4x8xf32> to vector<4x8x1xf32>
    %cst_35 = arith.constant 9.99999982E-14 : f32
    %121 = vector.broadcast %cst_35 : f32 to vector<4x8x1xf32>
    %122 = arith.addf %120, %121 : vector<4x8x1xf32>
    %123 = vector.broadcast %122 : vector<4x8x1xf32> to vector<4x8x8xf32>
    %124 = arith.divf %118, %123 : vector<4x8x8xf32>
    %125 = vector.shape_cast %104 : vector<4x8x8xf32> to vector<4x64xf32>
    %c20 = arith.constant 20 : index
    %c0_36 = arith.constant 0 : index
    %126 = vector.load %arg3[%c20, %c0_36] : memref<24x128xf32, #tpu.memory_space<vmem>>, vector<4x64xf32>
    tpu.vector_store %arg3[%c20, %c0_36], %125 {strides = array<i32>} : memref<24x128xf32, #tpu.memory_space<vmem>>, vector<4x64xf32>,
    %127 = vector.shape_cast %124 : vector<4x8x8xf32> to vector<4x64xf32>
    %c20_37 = arith.constant 20 : index
    %c64_38 = arith.constant 64 : index
    %128 = vector.load %arg3[%c20_37, %c64_38] : memref<24x128xf32, #tpu.memory_space<vmem>>, vector<4x64xf32>
    tpu.vector_store %arg3[%c20_37, %c64_38], %127 {strides = array<i32>} : memref<24x128xf32, #tpu.memory_space<vmem>>, vector<4x64xf32>,
    "tpu.trace_start"() <{level = 10 : i32, message = "hqk,hkd->hqd"}> : () -> ()
    %cst_39 = arith.constant dense<0.000000e+00> : vector<4x8x8xf32>
    %129 = tpu.matmul %124, %89, %cst_39 {dimension_numbers = #tpu.dot_dimension_numbers<[2], [1], [1], [2], [0, 0, 0, 1, 1, 2], [0], [0]>} : vector<4x8x8xf32>, vector<4x8x8xf32>, vector<4x8x8xf32> -> vector<4x8x8xf32>
    "tpu.trace_stop"() : () -> ()
    %130 = tpu.concatenate %86, %129 in 1 : vector<4x8x8xf32>, vector<4x8x8xf32> -> vector<4x16x8xf32>
    %131 = tpu.transpose %130, [1, 0, 2] : vector<4x16x8xf32> -> vector<16x4x8xf32>
    %132 = vector.shape_cast %131 : vector<16x4x8xf32> to vector<16x32xf32>
    %cst_40 = arith.constant dense<0.000000e+00> : vector<16x32xf32>
    %133 = tpu.matmul %132, %3, %cst_40 {dimension_numbers = #tpu.dot_dimension_numbers<[1], [0], [0], [1], [0, 0, 1, 1], [], []>} : vector<16x32xf32>, vector<32x32xf32>, vector<16x32xf32> -> vector<16x32xf32>
    %134 = vector.broadcast %12 : vector<1x32xf32> to vector<16x32xf32>
    %135 = arith.addf %133, %134 : vector<16x32xf32>
    %136 = arith.addf %0, %135 : vector<16x32xf32>
    %cst_41 = arith.constant dense<0.000000e+00> : vector<16xf32>
    %137 = vector.multi_reduction <add>, %136, %cst_41 [1] : vector<16x32xf32> to vector<16xf32>
    %138 = vector.shape_cast %137 : vector<16xf32> to vector<16x1xf32>
    %cst_42 = arith.constant 3.200000e+01 : f32
    %139 = vector.broadcast %cst_42 : f32 to vector<16x1xf32>
    %140 = arith.divf %138, %139 : vector<16x1xf32>
    %141 = vector.broadcast %140 : vector<16x1xf32> to vector<16x32xf32>
    %142 = arith.subf %136, %141 : vector<16x32xf32>
    %143 = vector.broadcast %140 : vector<16x1xf32> to vector<16x32xf32>
    %144 = arith.subf %136, %143 : vector<16x32xf32>
    %145 = arith.mulf %142, %144 : vector<16x32xf32>
    %cst_43 = arith.constant dense<0.000000e+00> : vector<16xf32>
    %146 = vector.multi_reduction <add>, %145, %cst_43 [1] : vector<16x32xf32> to vector<16xf32>
    %147 = vector.shape_cast %146 : vector<16xf32> to vector<16x1xf32>
    %cst_44 = arith.constant 3.200000e+01 : f32
    %148 = vector.broadcast %cst_44 : f32 to vector<16x1xf32>
    %149 = arith.divf %147, %148 : vector<16x1xf32>
    %150 = vector.broadcast %140 : vector<16x1xf32> to vector<16x32xf32>
    %151 = arith.subf %136, %150 : vector<16x32xf32>
    %cst_45 = arith.constant 9.99999974E-6 : f32
    %152 = vector.broadcast %cst_45 : f32 to vector<16x1xf32>
    %153 = arith.addf %149, %152 : vector<16x1xf32>
    %154 = math.rsqrt %153 : vector<16x1xf32>
    %155 = vector.broadcast %154 : vector<16x1xf32> to vector<16x32xf32>
    %156 = arith.mulf %151, %155 : vector<16x32xf32>
    %157 = vector.broadcast %9 : vector<1x32xf32> to vector<16x32xf32>
    %158 = arith.mulf %156, %157 : vector<16x32xf32>
    %159 = vector.broadcast %10 : vector<1x32xf32> to vector<16x32xf32>
    %160 = arith.addf %158, %159 : vector<16x32xf32>
    %cst_46 = arith.constant dense<0.000000e+00> : vector<16x64xf32>
    %161 = tpu.matmul %160, %4, %cst_46 {dimension_numbers = #tpu.dot_dimension_numbers<[1], [0], [0], [1], [0, 0, 1, 1], [], []>} : vector<16x32xf32>, vector<32x64xf32>, vector<16x64xf32> -> vector<16x64xf32>
    %162 = vector.broadcast %13 : vector<1x64xf32> to vector<16x64xf32>
    %163 = arith.addf %161, %162 : vector<16x64xf32>
    %cst_47 = arith.constant 0.000000e+00 : f32
    %164 = vector.broadcast %cst_47 : f32 to vector<16x64xf32>
    %165 = arith.maximumf %163, %164 : vector<16x64xf32>
    %cst_48 = arith.constant dense<0.000000e+00> : vector<16x32xf32>
    %166 = tpu.matmul %165, %5, %cst_48 {dimension_numbers = #tpu.dot_dimension_numbers<[1], [0], [0], [1], [0, 0, 1, 1], [], []>} : vector<16x64xf32>, vector<64x32xf32>, vector<16x32xf32> -> vector<16x32xf32>
    %167 = vector.broadcast %14 : vector<1x32xf32> to vector<16x32xf32>
    %168 = arith.addf %166, %167 : vector<16x32xf32>
    %169 = arith.addf %136, %168 : vector<16x32xf32>
    %c0_49 = arith.constant 0 : index
    %c0_50 = arith.constant 0 : index
    %170 = vector.load %arg3[%c0_49, %c0_50] : memref<24x128xf32, #tpu.memory_space<vmem>>, vector<16x32xf32>
    tpu.vector_store %arg3[%c0_49, %c0_50], %169 {strides = array<i32>} : memref<24x128xf32, #tpu.memory_space<vmem>>, vector<16x32xf32>,
    return
  }
}

</mosaic_0001>

<bundles_post_ra>
// kernel: encoder_layer.1
= control target key start
LH: loop header
LB: loop body
LE: loop exit
PB: predicated region body
PF: predicated region fallthrough
CT: control target
= control target key end

     0   :  { %8 = vsyncpa [#allocation3], 0  ;;  %s4718_s0 = inlined_call_operand.hbm [shape: f32[16,32], index: 0, kind: input, shape index: {}]   ;;  %s4719_s1 = inlined_call_operand.vmem [shape: f32[2,8], index: 1, kind: input, shape index: {}]   ;;  %s4720_s2 = inlined_call_operand.hbm [shape: f32[132,128], index: 2, kind: input, shape index: {}]   ;;  %s4721_s3 = inlined_call_operand.vmem [shape: f32[24,128], index: 3, kind: output, shape index: {}]  }
   0x1   :  { %9 = vsyncpa [#allocation5], 0  ;;  %s3952_s12 = smov [#allocation2]  }
   0x2   :  { %s15_s13 = sshll.u32 %s3952_s12, 4  ;;  %s16_s13 = int_to_ptr.vmem [resolvable:$true] %s15_s13 }
   0x3   :  { %s3916_s14 = scalar_lea.vmem %s16_s13, 256  ;;  %p3921_p1 = scmp.lt.s32.totalorder %s16_s13, %s16_s13 }
   0x4   :  { %p3917_p0 = scmp.ne.s32.totalorder %s16_s13, %s3916_s14  ;;  %p3922_p2 = scmp.lt.s32.totalorder %s3916_s14, %s3916_s14 }
   0x6   :  { %p3923_p3 = por %p3922_p2, %p3921_p1 }
   0x8   :  { %p3924_p4 = pnand %p3923_p3, %p3917_p0 }
   0xa   :  { %3927 = shalt.err (!%p3924_p4)
}
   0xb   :  { %s3953_s15 = smov 128   ;;  %s3954_s16 = smov 8  }
   0xc   :  { %21 = dma.hbm_to_vmem [thread:$0]  %s4718_s0, 256, %s16_s13, [#allocation3], %s3953_s15, %s3953_s15, %s3954_s16  }
   0xd   :  { %s3955_s19 = smov [#allocation4]  }
   0xe   :  { %s29_s20 = sshll.u32 %s3955_s19, 4  ;;  %s30_s20 = int_to_ptr.vmem [resolvable:$true] %s29_s20 }
   0xf   :  { %s3936_s21 = scalar_lea.vmem %s30_s20, 2176  ;;  %p3941_p6 = scmp.lt.s32.totalorder %s30_s20, %s30_s20 }
  0x10   :  { %p3937_p5 = scmp.ne.s32.totalorder %s30_s20, %s3936_s21  ;;  %p3942_p7 = scmp.lt.s32.totalorder %s3936_s21, %s3936_s21 }
  0x12   :  { %p3943_p8 = por %p3942_p7, %p3941_p6 }
  0x14   :  { %p3944_p9 = pnand %p3943_p8, %p3937_p5 }
  0x16   :  { %3947 = shalt.err (!%p3944_p9)
}
  0x17   :  { %35 = dma.hbm_to_vmem [thread:$0]  %s4720_s2, 2176, %s30_s20, [#allocation5], %s3953_s15, %s3953_s15, %s3954_s16  }
  0x18   :  { %3948 = dma.done.wait [#allocation3], 256  }
  0x19   :  { %3949 = vsyncadd [#allocation3], 4294967040 }
  0x1a   :  { %3950 = dma.done.wait [#allocation5], 2176  }
  0x1b   :  { %3951 = vsyncadd [#allocation5], 4294965120  ;;  %vm62_vm0 = vcmask 261120   ;;  %v42_v0 = vld [vmem:[#allocation2] sm:$0xff]  ;;  %v43_v1 = vld [vmem:[#allocation2 + $0x8] sm:$0xff]  ;;  %v90_v4 = vlaneseq  ;;  %s3956_s0 = smov 96  }
  0x1c   :  { %v63_v2 = vsel %vm62_vm0, %v42_v0, 0.0  ;;  %v66_v3 = vsel %vm62_vm0, %v43_v1, 0.0  ;;  %v61_v6 = vld [vmem:[#allocation4 + $0x80] sm:$0xf]  ;;  %v48_v19 = vld [vmem:[#allocation4 + $0x18] sm:$0xff]  ;;  %v47_v20 = vld [vmem:[#allocation4 + $0x10] sm:$0xff] }
  0x1d   :  { %64 = vadd.xlane.f32.xlu0 %v63_v2  ;;  %v4005_v5 = vshrl.u32 %v90_v4, 7  ;;  %3688 = vmatprep.subr.mxu1 %v48_v19  ;;  %v46_v21 = vld [vmem:[#allocation4 + $0x8] sm:$0xff]  ;;  %v45_v22 = vld [vmem:[#allocation4] sm:$0xff]  ;;  %s3957_s2 = smov 72   ;;  %s3958_s24 = smov 112   ;;  %v3962_v43 = vmov 0.0  }
  0x1e   :  { %3689 = vmatpush3.msra.mxu1 %v48_v19  ;;  %s3959_s25 = smov 88   ;;  %s3960_s26 = smov 80   ;;  %3709 = vmatprep.subr.mxu0 %v3962_v43  ;;  %vm3964_vm1 = vmmov 0   ;;  %v4053_v44 = vld [vmem:[%s4719_s1] sm:$0x3]  ;;  %v3965_v45 = vmov 0  }
  0x1f   :  { %v92_v7 = vsub.s32 0, %v4005_v5  ;;  %3690 = vmatprep.subr.mxu1 %v47_v20  ;;  %v104_v38 = vsub.s32 1, %v4005_v5  ;;  %s3961_s27 = smov 120   ;;  %s3963_s28 = smov 104   ;;  %3711 = vmatprep.mubr.msk.f32.mxu0 %vm3964_vm1, %v3962_v43  ;;  %v3966_v46 = vmov 1983009808  }
  0x20   :  { %3691 = vmatpush3.msra.mxu1 %v47_v20  ;;  %3843 = vset.pattern.permute.xlu1 %v3965_v45  ;;  %v258_v47 = vunpack.c.l.s4 %v3966_v46  ;;  %v3967_v49 = vmov 1934713408   ;;  %vm1115_vm2 = vcmask 64512   ;;  %s3968_s1 = smov 56   ;;  %s3969_s4 = smov 64   ;;  %vm1597_vm3 = vcmask 130048  }
  0x21   :  { %67 = vadd.xlane.f32.xlu0 %v66_v3  ;;  %v4010_v8 = vrot.slane %v61_v6, %v92_v7  ;;  %3692 = vmatprep.subr.mxu1 %v46_v21  ;;  %v4025_v40 = vrot.slane %v61_v6, %v104_v38  ;;  %v322_v50 = vunpack.c.l.s4 %v3967_v49  ;;  %s3970_s5 = smov 48   ;;  %s3971_s6 = smov 40   ;;  %vm1599_vm4 = vcmask 195584  }
  0x22   :  { %3693 = vmatpush3.msra.mxu1 %v46_v21  ;;  %v259_v51 = vunpack.c.0.s8 %v258_v47  ;;  %s3972_s7 = smov 32   ;;  %s3973_s8 = smov 16   ;;  %vm1602_vm5 = vcmask 326656   ;;  %vm1604_vm6 = vcmask 392192   ;;  %vm1606_vm7 = vcmask 457728  }
  0x23   :  { %3694 = vmatprep.subr.mxu1 %v45_v22  ;;  %v323_v53 = vunpack.c.0.s8 %v322_v50  ;;  %s3974_s9 = smov 24   ;;  %vm1608_vm8 = vcmask 519168   ;;  %vm1717_vm9 = vcmask 1043968   ;;  %vm3478_vm10 = vcmask 523264  }
  0x24   :  { %3695 = vmatpush3.msra.mxu1 %v45_v22  ;;  %v4057_v55 = vsub.s32 %v259_v51, %v4005_v5 }
  0x25   :  { %3699 = vmatprep.subr.mxu1 %v3962_v43  ;;  %v4060_v61 = vsub.s32 %v323_v53, %v4005_v5 }
  0x37   :  { %97 = vrot.lane.b32.xlu0 %v4010_v8, %s3956_s0 }
  0xa6   :  { %v65_v9 = vpop.xlane.xlu0 %64 }
  0xa7   :  { %v70_v10 = vmul.f32 0.03125, %v65_v9 }
  0xa9   :  { %v72_v11 = vsub.f32 %v42_v0, %v70_v10 }
  0xaa   :  { %v68_v12 = vpop.xlane.xlu0 %67 }
  0xab   :  { %v71_v13 = vmul.f32 0.03125, %v68_v12  ;;  %v74_v14 = vmul.f32 %v72_v11, %v72_v11 }
  0xad   :  { %v73_v15 = vsub.f32 %v43_v1, %v71_v13  ;;  %v76_v16 = vsel %vm62_vm0, %v74_v14, 0.0 }
  0xae   :  { %77 = vadd.xlane.f32.xlu1 %v76_v16  ;;  %v98_v31 = vpop.permute.xlu0 %97 }
  0xaf   :  { %v75_v17 = vmul.f32 %v73_v15, %v73_v15 }
  0xb1   :  { %v79_v18 = vsel %vm62_vm0, %v75_v17, 0.0 }
  0xb2   :  { %80 = vadd.xlane.f32.xlu1 %v79_v18 }
 0x137   :  { %v78_v23 = vpop.xlane.xlu1 %77 }
 0x138   :  { %v82_v24 = vmul.f32 0.03125, %v78_v23 }
 0x13a   :  { %v84_v25 = vadd.f32 1e-05, %v82_v24 }
 0x13b   :  { %v81_v26 = vpop.xlane.xlu1 %80 }
 0x13c   :  { %3845 = vrsqrt.f32 %v84_v25  ;;  %v83_v27 = vmul.f32 0.03125, %v81_v26 }
 0x13e   :  { %v85_v28 = vadd.f32 1e-05, %v83_v27 }
 0x140   :  { %3847 = vrsqrt.f32 %v85_v28 }
 0x149   :  { %v3846_v29 = vpop.eup %3845 }
 0x14a   :  { %v88_v30 = vmul.f32 %v3846_v29, %v72_v11 }
 0x14c   :  { %v94_v32 = vmul.f32 %v4010_v8, %v88_v30 }
 0x14d   :  { %v3848_v33 = vpop.eup %3847 }
 0x14e   :  { %v89_v34 = vmul.f32 %v3848_v33, %v73_v15  ;;  %v100_v35 = vadd.f32 %v98_v31, %v94_v32 }
 0x150   :  { %v95_v36 = vmul.f32 %v4010_v8, %v89_v34  ;;  %3696 = vmatprep.mubr.msk.f32.mxu1 %vm62_vm0, %v100_v35 }
 0x152   :  { %v101_v37 = vadd.f32 %v98_v31, %v95_v36 }
 0x154   :  { %3697 = vmatmul.mubr.msk.f32.vlgmr.msra.gmra.mxu1 %vm62_vm0, %v101_v37 }
 0x155   :  { %3701 = vmatprep.mubr.msk.f32.mxu1 %vm3964_vm1, %v3962_v43 }
 0x214   :  { %v4021_v39 = vpop.f32.mrf.mxu1 }
 0x216   :  { %v178_v41 = vpop.f32.mrf.mxu1 }
 0x217   :  { %v4028_v42 = vadd.f32 %v178_v41, %v4025_v40 }
 0x219   :  { %225 = vrot.lane.b32.xlu0 %v4028_v42, %s3957_s2  ;;  %207 = vrot.lane.b32.xlu1 %v4028_v42, %s3956_s0 }
 0x21d   :  { %195 = vrot.lane.b32.xlu0 %v4028_v42, %s3958_s24  ;;  %213 = vrot.lane.b32.xlu1 %v4028_v42, %s3959_s25 }
 0x221   :  { %219 = vrot.lane.b32.xlu1 %v4028_v42, %s3960_s26 }
 0x225   :  { %189 = vrot.lane.b32.xlu1 %v4028_v42, %s3961_s27 }
 0x229   :  { %201 = vrot.lane.b32.xlu1 %v4028_v42, %s3963_s28 }
 0x23b   :  { %1071 = vxpose.xlu0.b32.start.end [1/1] (short) (narrow) %v4053_v44, 8 }
 0x264   :  { %3844 = vset.pattern.permute.xlu0 %v3965_v45 }
 0x28b   :  { %v208_v48 = vpop.permute.xlu1 %207  ;;  %v226_v54 = vpop.permute.xlu0 %225 }
 0x28f   :  { %v214_v52 = vpop.permute.xlu1 %213  ;;  %v196_v3 = vpop.permute.xlu0 %195 }
 0x290   :  { %v303_v56 = vcombine.low %v214_v52, %v226_v54  ;;  %v304_v57 = vcombine.high %v214_v52, %v226_v54  ;;  %v255_v15 = vcombine.low %v4028_v42, %v196_v3  ;;  %v256_v16 = vcombine.high %v4028_v42, %v196_v3 }
 0x292   :  { %v311_v62 = vrot.slane %v303_v56, %v4057_v55  ;;  %v318_v63 = vrot.slane %v304_v57, %v4057_v55  ;;  %v263_v28 = vrot.slane %v255_v15, %v4057_v55  ;;  %v270_v29 = vrot.slane %v256_v16, %v4057_v55 }
 0x293   :  { %v220_v58 = vpop.permute.xlu1 %219 }
 0x294   :  { %v287_v59 = vcombine.low %v208_v48, %v220_v58  ;;  %v288_v60 = vcombine.high %v208_v48, %v220_v58 }
 0x296   :  { %v295_v0 = vrot.slane %v287_v59, %v4057_v55  ;;  %v302_v1 = vrot.slane %v288_v60, %v4057_v55 }
 0x297   :  { %v190_v2 = vpop.permute.xlu1 %189 }
 0x298   :  { %v351_v4 = vcombine.low %v295_v0, %v311_v62  ;;  %v352_v6 = vcombine.high %v295_v0, %v311_v62  ;;  %v367_v9 = vcombine.low %v302_v1, %v318_v63  ;;  %v368_v10 = vcombine.high %v302_v1, %v318_v63 }
 0x29a   :  { %v359_v11 = vrot.slane %v351_v4, %v4060_v61  ;;  %v366_v12 = vrot.slane %v352_v6, %v4060_v61  ;;  %v375_v13 = vrot.slane %v367_v9, %v4060_v61  ;;  %v382_v14 = vrot.slane %v368_v10, %v4060_v61 }
 0x29b   :  { %v202_v17 = vpop.permute.xlu1 %201 }
 0x29c   :  { %v3573_v18 = vcombine.low %v359_v11, %v366_v12  ;;  %v3575_v19 = vcombine.high %v359_v11, %v366_v12  ;;  %v3577_v20 = vcombine.low %v375_v13, %v382_v14  ;;  %v3579_v21 = vcombine.high %v375_v13, %v382_v14 }
 0x29d   :  { %v271_v22 = vcombine.low %v190_v2, %v202_v17  ;;  %v272_v23 = vcombine.high %v190_v2, %v202_v17 }
 0x29e   :  { %v678_v24 = vrot.slane %v3573_v18, %v4057_v55  ;;  %v694_v25 = vrot.slane %v3575_v19, %v4057_v55  ;;  %v710_v26 = vrot.slane %v3577_v20, %v4057_v55  ;;  %v726_v27 = vrot.slane %v3579_v21, %v4057_v55 }
 0x29f   :  { %v279_v30 = vrot.slane %v271_v22, %v4057_v55  ;;  %v286_v31 = vrot.slane %v272_v23, %v4057_v55  ;;  %v1111_v20 = vrot.slane %v4053_v44, %v92_v7 }
 0x2a0   :  { %v743_v32 = vcombine.low %v678_v24, %v694_v25  ;;  %v775_v33 = vcombine.low %v710_v26, %v726_v27  ;;  %v744_v34 = vcombine.high %v678_v24, %v694_v25  ;;  %v776_v35 = vcombine.high %v710_v26, %v726_v27 }
 0x2a1   :  { %v319_v36 = vcombine.low %v263_v28, %v279_v30  ;;  %v320_v37 = vcombine.high %v263_v28, %v279_v30  ;;  %v335_v41 = vcombine.low %v270_v29, %v286_v31  ;;  %v336_v45 = vcombine.high %v270_v29, %v286_v31 }
 0x2a2   :  { %v751_v46 = vrot.slane %v743_v32, %v4060_v61  ;;  %v783_v47 = vrot.slane %v775_v33, %v4060_v61  ;;  %v758_v48 = vrot.slane %v744_v34, %v4060_v61  ;;  %v790_v49 = vrot.slane %v776_v35, %v4060_v61 }
 0x2a3   :  { %v327_v50 = vrot.slane %v319_v36, %v4060_v61  ;;  %v334_v51 = vrot.slane %v320_v37, %v4060_v61  ;;  %v343_v52 = vrot.slane %v335_v41, %v4060_v61  ;;  %v350_v53 = vrot.slane %v336_v45, %v4060_v61 }
 0x2a4   :  { %v795_v54 = vcombine.low %v751_v46, %v783_v47  ;;  %v797_v56 = vcombine.low %v758_v48, %v790_v49  ;;  %v796_v15 = vcombine.high %v751_v46, %v783_v47  ;;  %v798_v17 = vcombine.high %v758_v48, %v790_v49 }
 0x2a5   :  { %v3572_v57 = vcombine.low %v327_v50, %v334_v51  ;;  %v3574_v58 = vcombine.high %v327_v50, %v334_v51  ;;  %v3576_v59 = vcombine.low %v343_v52, %v350_v53  ;;  %v3578_v60 = vcombine.high %v343_v52, %v350_v53 }
 0x2a6   :  { %3700 = vmatpush3.xpose.msk.msra.mxu1 %vm1115_vm2, %v795_v54  ;;  %3710 = vmatpush3.xpose.msk.msra.mxu0 %vm1115_vm2, %v797_v56  ;;  %v4144_v50 = vadd.f32 %v4021_v39, %v4025_v40 }
 0x2a7   :  { %v671_v62 = vrot.slane %v3572_v57, %v4057_v55  ;;  %v687_v63 = vrot.slane %v3574_v58, %v4057_v55  ;;  %v703_v0 = vrot.slane %v3576_v59, %v4057_v55  ;;  %v719_v1 = vrot.slane %v3578_v60, %v4057_v55  ;;  %3704 = vmatprep.subr.mxu1 %v3962_v43 }
 0x2a8   :  { %3719 = vmatprep.subr.mxu0 %v3962_v43 }
 0x2a9   :  { %v727_v2 = vcombine.low %v671_v62, %v687_v63  ;;  %v759_v3 = vcombine.low %v703_v0, %v719_v1  ;;  %v728_v4 = vcombine.high %v671_v62, %v687_v63  ;;  %v760_v6 = vcombine.high %v703_v0, %v719_v1 }
 0x2ab   :  { %v735_v9 = vrot.slane %v727_v2, %v4060_v61  ;;  %v767_v10 = vrot.slane %v759_v3, %v4060_v61  ;;  %v742_v11 = vrot.slane %v728_v4, %v4060_v61  ;;  %v774_v12 = vrot.slane %v760_v6, %v4060_v61 }
 0x2ad   :  { %v791_v13 = vcombine.low %v735_v9, %v767_v10  ;;  %v793_v14 = vcombine.low %v742_v11, %v774_v12  ;;  %v792_v16 = vcombine.high %v735_v9, %v767_v10  ;;  %v794_v18 = vcombine.high %v742_v11, %v774_v12 }
 0x2af   :  { %3702 = vmatmul.mubr.msk.f32.vlgmr.msra.gmra.mxu1 %vm1115_vm2, %v791_v13  ;;  %3712 = vmatmul.mubr.msk.f32.vlgmr.msra.gmra.mxu0 %vm1115_vm2, %v793_v14 }
 0x2b0   :  { %3705 = vmatpush3.xpose.msk.msra.mxu1 %vm1115_vm2, %v796_v15  ;;  %3706 = vmatprep.mubr.msk.f32.mxu1 %vm3964_vm1, %v3962_v43 }
 0x2b1   :  { %3714 = vmatprep.subr.mxu1 %v3962_v43  ;;  %3721 = vmatprep.mubr.msk.f32.mxu0 %vm3964_vm1, %v3962_v43 }
 0x2b3   :  { %3707 = vmatmul.mubr.msk.f32.vlgmr.msra.gmra.mxu1 %vm1115_vm2, %v792_v16 }
 0x2b4   :  { %3715 = vmatpush3.xpose.msk.msra.mxu1 %vm1115_vm2, %v798_v17  ;;  %3716 = vmatprep.mubr.msk.f32.mxu1 %vm3964_vm1, %v3962_v43 }
 0x2b5   :  { %3724 = vmatprep.subr.mxu1 %v3962_v43 }
 0x2b7   :  { %3717 = vmatmul.mubr.msk.f32.vlgmr.msra.gmra.mxu1 %vm1115_vm2, %v794_v18  ;;  %v1087_v19 = vpop.trf.xlu0 }
 0x2b8   :  { %1105 = vperm.xlu1 %3843, %v1087_v19   ;;  %3726 = vmatprep.mubr.msk.f32.mxu1 %vm3964_vm1, %v3962_v43 }
 0x333   :  { %v1106_v21 = vpop.permute.xlu1 %1105 }
 0x334   :  { %v4119_v22 = vmul.f32 %v1111_v20, %v1106_v21 }
 0x336   :  { %v3592_v23 = vadd.f32 -1.0, %v4119_v22 }
 0x338   :  { %v1114_v24 = vmul.f32 1e+09, %v3592_v23 }
 0x36f   :  { %v1188_v25 = vpop.f32.mrf.mxu1  ;;  %v1340_v26 = vpop.f32.mrf.mxu0 }
 0x370   :  { %v1420_v27 = vmul.f32 0.35355338, %v1188_v25  ;;  %v1422_v28 = vmul.f32 0.35355338, %v1340_v26 }
 0x371   :  { %v3703_v29 = vpop.f32.mrf.mxu1  ;;  %v3713_v30 = vpop.f32.mrf.mxu0 }
 0x372   :  { %v4122_v31 = vadd.f32 %v1420_v27, %v1114_v24  ;;  %v4124_v33 = vadd.f32 %v1422_v28, %v1114_v24 }
 0x373   :  { %v1264_v32 = vpop.f32.mrf.mxu1 }
 0x374   :  { %v1421_v34 = vmul.f32 0.35355338, %v1264_v32  ;;  %v1428_v7 = vsel %vm1115_vm2, %v4122_v31, -inf  ;;  %v1434_v46 = vsel %vm1115_vm2, %v4124_v33, -inf }
 0x375   :  { %v3708_v35 = vpop.f32.mrf.mxu1  ;;  %1429 = vmax.xlane.f32.xlu1 %v1428_v7 }
 0x376   :  { %v4128_v36 = vadd.f32 %v1421_v34, %v1114_v24 }
 0x377   :  { %v1416_v37 = vpop.f32.mrf.mxu1 }
 0x378   :  { %v1423_v41 = vmul.f32 0.35355338, %v1416_v37  ;;  %v1431_v45 = vsel %vm1115_vm2, %v4128_v36, -inf }
 0x379   :  { %v3718_v47 = vpop.f32.mrf.mxu1  ;;  %1432 = vmax.xlane.f32.xlu0 %v1431_v45  ;;  %1435 = vmax.xlane.f32.xlu1 %v1434_v46 }
 0x37a   :  { %v4134_v48 = vadd.f32 %v1423_v41, %v1114_v24 }
 0x37c   :  { %v1437_v49 = vsel %vm1115_vm2, %v4134_v48, -inf }
 0x37d   :  { %1438 = vmax.xlane.f32.xlu1 %v1437_v49 }
 0x38e   :  { %237 = vrot.lane.b32.xlu1 %v4028_v42, %s3968_s1 }
 0x38f   :  { %231 = vrot.lane.b32.xlu0 %v4028_v42, %s3969_s4 }
 0x392   :  { %243 = vrot.lane.b32.xlu1 %v4028_v42, %s3970_s5 }
 0x393   :  { %209 = vrot.lane.b32.xlu0 %v4144_v50, %s3956_s0 }
 0x397   :  { %221 = vrot.lane.b32.xlu0 %v4144_v50, %s3960_s26 }
 0x39b   :  { %191 = vrot.lane.b32.xlu0 %v4144_v50, %s3961_s27 }
 0x3fe   :  { %v1430_v51 = vpop.xlane.xlu1 %1429 }
 0x3ff   :  { %v1440_v52 = vsub.f32 %v4122_v31, %v1430_v51 }
 0x401   :  { %v1444_v53 = vmul.f32 1.442695, %v1440_v52 }
 0x402   :  { %v1433_v54 = vpop.xlane.xlu0 %1432  ;;  %v1436_v39 = vpop.xlane.xlu1 %1435 }
 0x403   :  { %3849 = vpow2.f32 %v1444_v53  ;;  %v1441_v56 = vsub.f32 %v4128_v36, %v1433_v54  ;;  %v1442_v57 = vsub.f32 %v4124_v33, %v1436_v39 }
 0x405   :  { %v1448_v58 = vmul.f32 1.442695, %v1442_v57  ;;  %v1446_v59 = vmul.f32 1.442695, %v1441_v56 }
 0x406   :  { %v1439_v60 = vpop.xlane.xlu1 %1438  ;;  %v232_v17 = vpop.permute.xlu0 %231 }
 0x407   :  { %v1443_v62 = vsub.f32 %v4134_v48, %v1439_v60  ;;  %3851 = vpow2.f32 %v1448_v58 }
 0x408   :  { %3853 = vpow2.f32 %v1446_v59 }
 0x409   :  { %v1450_v63 = vmul.f32 1.442695, %v1443_v62 }
 0x40a   :  { %v238_v11 = vpop.permute.xlu1 %237 }
 0x40b   :  { %3855 = vpow2.f32 %v1450_v63 }
 0x40e   :  { %v244_v12 = vpop.permute.xlu1 %243 }
 0x40f   :  { %v391_v19 = vcombine.low %v232_v17, %v244_v12 }
 0x410   :  { %v3850_v0 = vpop.eup %3849 }
 0x411   :  { %v1452_v1 = vsel %vm1115_vm2, %v3850_v0, 0.0  ;;  %v399_v27 = vrot.slane %v391_v19, %v4057_v55 }
 0x412   :  { %1453 = vadd.xlane.f32.xlu1 %v1452_v1 }
 0x414   :  { %v3852_v2 = vpop.eup %3851 }
 0x415   :  { %v1458_v3 = vsel %vm1115_vm2, %v3852_v2, 0.0  ;;  %v3854_v4 = vpop.eup %3853 }
 0x416   :  { %1459 = vadd.xlane.f32.xlu1 %v1458_v3  ;;  %v1455_v6 = vsel %vm1115_vm2, %v3854_v4, 0.0 }
 0x418   :  { %v3856_v9 = vpop.eup %3855 }
 0x419   :  { %v1461_v10 = vsel %vm1115_vm2, %v3856_v9, 0.0 }
 0x41a   :  { %1456 = vadd.xlane.f32.xlu1 %v1455_v6 }
 0x41e   :  { %1462 = vadd.xlane.f32.xlu1 %v1461_v10 }
 0x42f   :  { %249 = vrot.lane.b32.xlu1 %v4028_v42, %s3971_s6  ;;  %v392_v42 = vcombine.high %v232_v17, %v244_v12 }
 0x431   :  { %v406_v28 = vrot.slane %v392_v42, %v4057_v55  ;;  %v2012_v42 = vrot.slane %v4053_v44, 1 }
 0x433   :  { %215 = vrot.lane.b32.xlu1 %v4144_v50, %s3959_s25 }
 0x437   :  { %227 = vrot.lane.b32.xlu1 %v4144_v50, %s3957_s2 }
 0x49b   :  { %v1454_v13 = vpop.xlane.xlu1 %1453 }
 0x49c   :  { %3857 = vrcp.f32 %v1454_v13 }
 0x49f   :  { %v1460_v14 = vpop.xlane.xlu1 %1459 }
 0x4a0   :  { %3859 = vrcp.f32 %v1460_v14 }
 0x4a3   :  { %v1457_v15 = vpop.xlane.xlu1 %1456 }
 0x4a4   :  { %3861 = vrcp.f32 %v1457_v15 }
 0x4a7   :  { %v1463_v16 = vpop.xlane.xlu1 %1462 }
 0x4a8   :  { %3863 = vrcp.f32 %v1463_v16 }
 0x4a9   :  { %v3858_v18 = vpop.eup %3857 }
 0x4aa   :  { %v1465_v20 = vmul.f32 %v3858_v18, %v3850_v0 }
 0x4ab   :  { %v250_v21 = vpop.permute.xlu1 %249 }
 0x4ac   :  { %v407_v23 = vcombine.low %v238_v11, %v250_v21  ;;  %v408_v24 = vcombine.high %v238_v11, %v250_v21  ;;  %v4169_v25 = vmul.f32 %v1465_v20, %v4119_v22  ;;  %v210_v21 = vpop.permute.xlu0 %209 }
 0x4ad   :  { %v3860_v26 = vpop.eup %3859 }
 0x4ae   :  { %v415_v29 = vrot.slane %v407_v23, %v4057_v55  ;;  %v422_v30 = vrot.slane %v408_v24, %v4057_v55  ;;  %v1476_v32 = vsel %vm1115_vm2, %v4169_v25, 0.0  ;;  %v1469_v34 = vmul.f32 %v3860_v26, %v3852_v2 }
 0x4af   :  { %1477 = vadd.xlane.f32.xlu1 %v1476_v32  ;;  %v216_v20 = vpop.permute.xlu1 %215 }
 0x4b0   :  { %v423_v7 = vcombine.low %v399_v27, %v415_v29  ;;  %v424_v35 = vcombine.high %v399_v27, %v415_v29  ;;  %v439_v37 = vcombine.low %v406_v28, %v422_v30  ;;  %v440_v41 = vcombine.high %v406_v28, %v422_v30  ;;  %v222_v24 = vpop.permute.xlu0 %221 }
 0x4b1   :  { %v3862_v45 = vpop.eup %3861  ;;  %v4178_v46 = vmul.f32 %v1469_v34, %v4119_v22  ;;  %v491_v28 = vcombine.low %v210_v21, %v222_v24  ;;  %v492_v29 = vcombine.high %v210_v21, %v222_v24 }
 0x4b2   :  { %v431_v47 = vrot.slane %v423_v7, %v4060_v61  ;;  %v438_v49 = vrot.slane %v424_v35, %v4060_v61  ;;  %v447_v51 = vrot.slane %v439_v37, %v4060_v61  ;;  %v454_v52 = vrot.slane %v440_v41, %v4060_v61 }
 0x4b3   :  { %v1482_v53 = vsel %vm1115_vm2, %v4178_v46, 0.0  ;;  %v1467_v54 = vmul.f32 %v3862_v45, %v3854_v4  ;;  %v228_v23 = vpop.permute.xlu1 %227  ;;  %v499_v34 = vrot.slane %v491_v28, %v4057_v55  ;;  %v506_v7 = vrot.slane %v492_v29, %v4057_v55 }
 0x4b4   :  { %v935_v39 = vcombine.low %v431_v47, %v438_v49  ;;  %v3588_v56 = vcombine.high %v431_v47, %v438_v49  ;;  %v951_v57 = vcombine.low %v447_v51, %v454_v52  ;;  %v3589_v58 = vcombine.high %v447_v51, %v454_v52  ;;  %1483 = vadd.xlane.f32.xlu0 %v1482_v53  ;;  %v192_v49 = vpop.permute.xlu0 %191 }
 0x4b5   :  { %v3864_v59 = vpop.eup %3863  ;;  %v4187_v60 = vmul.f32 %v1467_v54, %v4119_v22  ;;  %v507_v26 = vcombine.low %v216_v20, %v228_v23  ;;  %v508_v27 = vcombine.high %v216_v20, %v228_v23 }
 0x4b6   :  { %v942_v62 = vrot.slane %v935_v39, %v4057_v55  ;;  %v950_v63 = vrot.slane %v3588_v56, %v4057_v55  ;;  %v958_v0 = vrot.slane %v951_v57, %v4057_v55  ;;  %v966_v1 = vrot.slane %v3589_v58, %v4057_v55 }
 0x4b7   :  { %v1479_v2 = vsel %vm1115_vm2, %v4187_v60, 0.0  ;;  %v1471_v3 = vmul.f32 %v3864_v59, %v3856_v9  ;;  %v515_v30 = vrot.slane %v507_v26, %v4057_v55  ;;  %v522_v32 = vrot.slane %v508_v27, %v4057_v55 }
 0x4b8   :  { %1480 = vadd.xlane.f32.xlu1 %v1479_v2  ;;  %v967_v4 = vcombine.low %v942_v62, %v950_v63  ;;  %v983_v6 = vcombine.low %v958_v0, %v966_v1  ;;  %v968_v10 = vcombine.high %v942_v62, %v950_v63  ;;  %v984_v11 = vcombine.high %v958_v0, %v966_v1 }
 0x4b9   :  { %v4196_v12 = vmul.f32 %v1471_v3, %v4119_v22  ;;  %v555_v35 = vcombine.low %v499_v34, %v515_v30  ;;  %v556_v37 = vcombine.high %v499_v34, %v515_v30  ;;  %v571_v41 = vcombine.low %v506_v7, %v522_v32 }
 0x4ba   :  { %v975_v13 = vrot.slane %v967_v4, %v4060_v61  ;;  %v991_v14 = vrot.slane %v983_v6, %v4060_v61  ;;  %v4201_v15 = vrot.slane %v968_v10, %v4060_v61  ;;  %v4206_v18 = vrot.slane %v984_v11, %v4060_v61 }
 0x4bb   :  { %v1485_v16 = vsel %vm1115_vm2, %v4196_v12, 0.0  ;;  %v572_v45 = vcombine.high %v506_v7, %v522_v32  ;;  %v563_v51 = vrot.slane %v555_v35, %v4060_v61  ;;  %v570_v52 = vrot.slane %v556_v37, %v4060_v61 }
 0x4bc   :  { %v999_v17 = vcombine.low %v975_v13, %v991_v14  ;;  %v1000_v9 = vcombine.high %v975_v13, %v991_v14  ;;  %1486 = vadd.xlane.f32.xlu1 %v1485_v16  ;;  %v1001_v22 = vcombine.low %v4201_v15, %v4206_v18  ;;  %v1002_v19 = vcombine.high %v4201_v15, %v4206_v18 }
 0x4bd   :  { %v579_v54 = vrot.slane %v571_v41, %v4060_v61  ;;  %v586_v39 = vrot.slane %v572_v45, %v4060_v61  ;;  %v3581_v56 = vcombine.low %v563_v51, %v570_v52  ;;  %v3583_v58 = vcombine.high %v563_v51, %v570_v52 }
 0x4be   :  { %3720 = vmatpush3.msra.mxu0 %v999_v17  ;;  %3725 = vmatpush3.msra.mxu1 %v1000_v9 }
 0x4bf   :  { %3729 = vmatprep.subr.mxu0 %v3962_v43  ;;  %3734 = vmatprep.subr.mxu1 %v3962_v43  ;;  %v3585_v59 = vcombine.low %v579_v54, %v586_v39  ;;  %v3587_v62 = vcombine.high %v579_v54, %v586_v39  ;;  %v4228_v0 = vrot.slane %v3581_v56, %v4057_v55 }
 0x4c0   :  { %v4231_v2 = vrot.slane %v3583_v58, %v4057_v55 }
 0x4c1   :  { %v4234_v3 = vrot.slane %v3585_v59, %v4057_v55  ;;  %v862_v4 = vrot.slane %v3587_v62, %v4057_v55 }
 0x4c2   :  { %v879_v10 = vcombine.low %v4228_v0, %v4231_v2  ;;  %v880_v54 = vcombine.high %v4228_v0, %v4231_v2 }
 0x4c3   :  { %v911_v11 = vcombine.low %v4234_v3, %v862_v4  ;;  %v912_v39 = vcombine.high %v4234_v3, %v862_v4 }
 0x4c4   :  { %v887_v23 = vrot.slane %v879_v10, %v4060_v61  ;;  %v894_v3 = vrot.slane %v880_v54, %v4060_v61 }
 0x4c5   :  { %v919_v24 = vrot.slane %v911_v11, %v4060_v61  ;;  %v926_v4 = vrot.slane %v912_v39, %v4060_v61 }
 0x4c7   :  { %v931_v7 = vcombine.low %v887_v23, %v919_v24 }
 0x4ca   :  { %203 = vrot.lane.b32.xlu0 %v4144_v50, %s3963_s28 }
 0x4cd   :  { %197 = vrot.lane.b32.xlu1 %v4144_v50, %s3958_s24 }
 0x4f6   :  { %2014 = vxpose.xlu1.b32.start.end [1/1] (short) (narrow) %v2012_v42, 8 }
 0x538   :  { %v1478_v47 = vpop.xlane.xlu1 %1477 }
 0x539   :  { %v1488_v53 = vadd.f32 1e-13, %v1478_v47 }
 0x53b   :  { %3865 = vrcp.f32 %v1488_v53 }
 0x53d   :  { %v1484_v57 = vpop.xlane.xlu0 %1483 }
 0x53e   :  { %v1490_v63 = vadd.f32 1e-13, %v1484_v57 }
 0x540   :  { %3867 = vrcp.f32 %v1490_v63 }
 0x541   :  { %v1481_v1 = vpop.xlane.xlu1 %1480  ;;  %v204_v13 = vpop.permute.xlu0 %203 }
 0x542   :  { %v1489_v6 = vadd.f32 1e-13, %v1481_v1  ;;  %v475_v9 = vcombine.low %v192_v49, %v204_v13  ;;  %v476_v42 = vcombine.high %v192_v49, %v204_v13 }
 0x544   :  { %3869 = vrcp.f32 %v1489_v6  ;;  %v490_v29 = vrot.slane %v476_v42, %v4057_v55 }
 0x545   :  { %v1487_v14 = vpop.xlane.xlu1 %1486 }
 0x546   :  { %v1491_v16 = vadd.f32 1e-13, %v1487_v14 }
 0x548   :  { %v3866_v17 = vpop.eup %3865  ;;  %3871 = vrcp.f32 %v1491_v16  ;;  %v932_v16 = vcombine.high %v887_v23, %v919_v24 }
 0x549   :  { %v4241_v20 = vmul.f32 %v3866_v17, %v4169_v25  ;;  %v198_v21 = vpop.permute.xlu1 %197  ;;  %v483_v25 = vrot.slane %v475_v9, %v4057_v55 }
 0x54a   :  { %v459_v26 = vcombine.low %v4144_v50, %v198_v21  ;;  %v460_v27 = vcombine.high %v4144_v50, %v198_v21 }
 0x54b   :  { %3722 = vmatmul.mubr.msk.f32.vlgmr.msra.gmra.mxu0 %vm1115_vm2, %v4241_v20 }
 0x54c   :  { %3730 = vmatpush3.msra.mxu0 %v1001_v22  ;;  %3731 = vmatprep.mubr.msk.f32.mxu0 %vm3964_vm1, %v3962_v43  ;;  %v467_v30 = vrot.slane %v459_v26, %v4057_v55  ;;  %v474_v32 = vrot.slane %v460_v27, %v4057_v55 }
 0x54d   :  { %v3868_v28 = vpop.eup %3867  ;;  %3739 = vmatprep.subr.mxu0 %v3962_v43 }
 0x54e   :  { %v1497_v34 = vmul.f32 %v3868_v28, %v4178_v46  ;;  %v523_v35 = vcombine.low %v467_v30, %v483_v25  ;;  %v524_v37 = vcombine.high %v467_v30, %v483_v25  ;;  %v539_v22 = vcombine.low %v474_v32, %v490_v29 }
 0x54f   :  { %v540_v41 = vcombine.high %v474_v32, %v490_v29  ;;  %v934_v28 = vcombine.high %v894_v3, %v926_v4 }
 0x550   :  { %3732 = vmatmul.mubr.msk.f32.vlgmr.msra.gmra.mxu0 %vm1115_vm2, %v1497_v34  ;;  %v1610_v45 = vcombine.low %v4241_v20, %v1497_v34  ;;  %v1611_v47 = vcombine.high %v4241_v20, %v1497_v34  ;;  %v531_v51 = vrot.slane %v523_v35, %v4060_v61  ;;  %v538_v52 = vrot.slane %v524_v37, %v4060_v61 }
 0x551   :  { %v3870_v49 = vpop.eup %3869  ;;  %v547_v53 = vrot.slane %v539_v22, %v4060_v61  ;;  %v554_v46 = vrot.slane %v540_v41, %v4060_v61  ;;  %3740 = vmatpush3.xpose.msk.msra.mxu0 %vm1115_vm2, %v931_v7  ;;  %3741 = vmatprep.mubr.msk.f32.mxu0 %vm3964_vm1, %v3962_v43 }
 0x552   :  { %v1495_v56 = vmul.f32 %v3870_v49, %v4187_v60  ;;  %3749 = vmatprep.subr.mxu0 %v3962_v43  ;;  %v3580_v57 = vcombine.low %v531_v51, %v538_v52  ;;  %v3582_v58 = vcombine.high %v531_v51, %v538_v52  ;;  %v4296_v23 = vrot.slane %v1610_v45, %v4057_v55 }
 0x553   :  { %v3584_v59 = vcombine.low %v547_v53, %v554_v46  ;;  %v3586_v62 = vcombine.high %v547_v53, %v554_v46  ;;  %v4302_v26 = vrot.slane %v1611_v47, %v4057_v55  ;;  %v2054_v45 = vrot.slane %v4053_v44, %v104_v38 }
 0x554   :  { %3727 = vmatmul.mubr.msk.f32.vlgmr.msra.gmra.mxu1 %vm1115_vm2, %v1495_v56  ;;  %v807_v63 = vrot.slane %v3580_v57, %v4057_v55  ;;  %v823_v1 = vrot.slane %v3582_v58, %v4057_v55 }
 0x555   :  { %v839_v0 = vrot.slane %v3584_v59, %v4057_v55  ;;  %v855_v2 = vrot.slane %v3586_v62, %v4057_v55  ;;  %3735 = vmatpush3.msra.mxu1 %v1002_v19  ;;  %v3872_v60 = vpop.eup %3871  ;;  %3736 = vmatprep.mubr.msk.f32.mxu1 %vm3964_vm1, %v3962_v43  ;;  %v933_v19 = vcombine.low %v894_v3, %v926_v4 }
 0x556   :  { %3744 = vmatprep.subr.mxu1 %v3962_v43  ;;  %v863_v6 = vcombine.low %v807_v63, %v823_v1  ;;  %v864_v10 = vcombine.high %v807_v63, %v823_v1  ;;  %v1499_v14 = vmul.f32 %v3872_v60, %v4196_v12 }
 0x557   :  { %v895_v11 = vcombine.low %v839_v0, %v855_v2  ;;  %v896_v13 = vcombine.high %v839_v0, %v855_v2 }
 0x558   :  { %v871_v15 = vrot.slane %v863_v6, %v4060_v61  ;;  %3737 = vmatmul.mubr.msk.f32.vlgmr.msra.gmra.mxu1 %vm1115_vm2, %v1499_v14  ;;  %v878_v17 = vrot.slane %v864_v10, %v4060_v61  ;;  %v1626_v9 = vcombine.low %v1495_v56, %v1499_v14  ;;  %v1627_v42 = vcombine.high %v1495_v56, %v1499_v14 }
 0x559   :  { %v903_v18 = vrot.slane %v895_v11, %v4060_v61  ;;  %3745 = vmatpush3.xpose.msk.msra.mxu1 %vm1115_vm2, %v932_v16  ;;  %3746 = vmatprep.mubr.msk.f32.mxu1 %vm3964_vm1, %v3962_v43  ;;  %v910_v12 = vrot.slane %v896_v13, %v4060_v61 }
 0x55a   :  { %3754 = vmatprep.subr.mxu1 %v3962_v43  ;;  %v4299_v24 = vrot.slane %v1626_v9, %v4057_v55  ;;  %v4305_v27 = vrot.slane %v1627_v42, %v4057_v55 }
 0x55b   :  { %v927_v20 = vcombine.low %v871_v15, %v903_v18  ;;  %v928_v21 = vcombine.high %v871_v15, %v903_v18  ;;  %v929_v32 = vcombine.low %v878_v17, %v910_v12  ;;  %v930_v7 = vcombine.high %v878_v17, %v910_v12 }
 0x55c   :  { %v1642_v25 = vcombine.low %v4296_v23, %v4299_v24  ;;  %v1643_v29 = vcombine.high %v4296_v23, %v4299_v24  ;;  %v1658_v30 = vcombine.low %v4302_v26, %v4305_v27  ;;  %v1659_v34 = vcombine.high %v4302_v26, %v4305_v27 }
 0x55d   :  { %3742 = vmatmul.mubr.msk.f32.vlgmr.msra.gmra.mxu0 %vm1115_vm2, %v927_v20  ;;  %3747 = vmatmul.mubr.msk.f32.vlgmr.msra.gmra.mxu1 %vm1115_vm2, %v928_v21  ;;  %v1500_v23 = vcombine.low %v4122_v31, %v4124_v33  ;;  %v1501_v26 = vcombine.high %v4122_v31, %v4124_v33 }
 0x55e   :  { %3750 = vmatpush3.xpose.msk.msra.mxu0 %vm1115_vm2, %v933_v19  ;;  %3755 = vmatpush3.xpose.msk.msra.mxu1 %vm1115_vm2, %v934_v28 }
 0x55f   :  { %3751 = vmatprep.mubr.msk.f32.mxu0 %vm3964_vm1, %v3962_v43  ;;  %3756 = vmatprep.mubr.msk.f32.mxu1 %vm3964_vm1, %v3962_v43 }
 0x560   :  { %3759 = vmatprep.subr.mxu0 %v3962_v43  ;;  %3764 = vmatprep.subr.mxu1 %v3962_v43 }
 0x561   :  { %3752 = vmatmul.mubr.msk.f32.vlgmr.msra.gmra.mxu0 %vm1115_vm2, %v929_v32  ;;  %3757 = vmatmul.mubr.msk.f32.vlgmr.msra.gmra.mxu1 %vm1115_vm2, %v930_v7 }
 0x562   :  { %3761 = vmatprep.mubr.msk.f32.mxu0 %vm3964_vm1, %v3962_v43  ;;  %3766 = vmatprep.mubr.msk.f32.mxu1 %vm3964_vm1, %v3962_v43 }
 0x572   :  { %v2030_v35 = vpop.trf.xlu1 }
 0x573   :  { %2048 = vperm.xlu0 %3844, %v2030_v35  }
 0x5ee   :  { %v2049_v47 = vpop.permute.xlu0 %2048 }
 0x5ef   :  { %v4334_v52 = vmul.f32 %v2054_v45, %v2049_v47 }
 0x5f1   :  { %v3605_v46 = vadd.f32 -1.0, %v4334_v52 }
 0x5f3   :  { %v2057_v62 = vmul.f32 1e+09, %v3605_v46 }
 0x60b   :  { %v1788_v37 = vpop.f32.mrf.mxu0 }
 0x60d   :  { %v3723_v22 = vpop.f32.mrf.mxu0 }
 0x610   :  { %v1934_v41 = vpop.f32.mrf.mxu0 }
 0x611   :  { %v2946_v54 = vcombine.low %v1788_v37, %v1934_v41  ;;  %v2947_v39 = vcombine.high %v1788_v37, %v1934_v41 }
 0x612   :  { %v3733_v49 = vpop.f32.mrf.mxu0 }
 0x613   :  { %v2954_v63 = vrot.slane %v2946_v54, %v4057_v55  ;;  %v2961_v1 = vrot.slane %v2947_v39, %v4057_v55 }
 0x614   :  { %v1861_v51 = vpop.f32.mrf.mxu1 }
 0x616   :  { %v3728_v53 = vpop.f32.mrf.mxu1 }
 0x618   :  { %v2007_v56 = vpop.f32.mrf.mxu1 }
 0x619   :  { %v2962_v57 = vcombine.low %v1861_v51, %v2007_v56  ;;  %v2963_v58 = vcombine.high %v1861_v51, %v2007_v56 }
 0x61a   :  { %v3738_v59 = vpop.f32.mrf.mxu1 }
 0x61b   :  { %v2970_v38 = vrot.slane %v2962_v57, %v4057_v55  ;;  %v2977_v44 = vrot.slane %v2963_v58, %v4057_v55 }
 0x61d   :  { %v2130_v0 = vpop.f32.mrf.mxu0  ;;  %v2206_v60 = vpop.f32.mrf.mxu1  ;;  %v2978_v3 = vcombine.low %v2954_v63, %v2970_v38  ;;  %v2979_v4 = vcombine.high %v2954_v63, %v2970_v38  ;;  %v2994_v6 = vcombine.low %v2961_v1, %v2977_v44  ;;  %v2995_v10 = vcombine.high %v2961_v1, %v2977_v44 }
 0x61e   :  { %v2362_v2 = vmul.f32 0.35355338, %v2130_v0  ;;  %v2363_v14 = vmul.f32 0.35355338, %v2206_v60  ;;  %v3901_v0 = vld [vmem:[#allocation4 + $0x10] sm:$0xff] }
 0x61f   :  { %v3743_v11 = vpop.f32.mrf.mxu0  ;;  %v3748_v16 = vpop.f32.mrf.mxu1  ;;  %v2986_v15 = vrot.slane %v2978_v3, %v4060_v61  ;;  %v2993_v18 = vrot.slane %v2979_v4, %v4060_v61  ;;  %v3002_v19 = vrot.slane %v2994_v6, %v4060_v61  ;;  %v3009_v17 = vrot.slane %v2995_v10, %v4060_v61  ;;  %v3902_v3 = vld [vmem:[#allocation4 + $0x8] sm:$0xff] }
 0x620   :  { %v4341_v13 = vadd.f32 %v2362_v2, %v2057_v62  ;;  %v4347_v42 = vadd.f32 %v2363_v14, %v2057_v62 }
 0x621   :  { %v2282_v9 = vpop.f32.mrf.mxu0  ;;  %v2358_v21 = vpop.f32.mrf.mxu1  ;;  %v3082_v28 = vcombine.low %v2986_v15, %v2993_v18  ;;  %v3618_v32 = vcombine.high %v2986_v15, %v2993_v18  ;;  %v3098_v7 = vcombine.low %v3002_v19, %v3009_v17  ;;  %v3619_v35 = vcombine.high %v3002_v19, %v3009_v17 }
 0x622   :  { %v2364_v20 = vmul.f32 0.35355338, %v2282_v9  ;;  %v2370_v12 = vsel %vm1115_vm2, %v4341_v13, -inf  ;;  %v2365_v41 = vmul.f32 0.35355338, %v2358_v21  ;;  %v2373_v39 = vsel %vm1115_vm2, %v4347_v42, -inf }
 0x623   :  { %v3753_v37 = vpop.f32.mrf.mxu0  ;;  %2371 = vmax.xlane.f32.xlu0 %v2370_v12  ;;  %v3758_v45 = vpop.f32.mrf.mxu1  ;;  %v3089_v47 = vrot.slane %v3082_v28, %v4057_v55  ;;  %v3097_v49 = vrot.slane %v3618_v32, %v4057_v55  ;;  %v3105_v51 = vrot.slane %v3098_v7, %v4057_v55  ;;  %v3113_v53 = vrot.slane %v3619_v35, %v4057_v55 }
 0x624   :  { %v4351_v22 = vadd.f32 %v2364_v20, %v2057_v62  ;;  %v4357_v46 = vadd.f32 %v2365_v41, %v2057_v62 }
 0x625   :  { %v3114_v56 = vcombine.low %v3089_v47, %v3097_v49  ;;  %v3130_v57 = vcombine.low %v3105_v51, %v3113_v53  ;;  %v3115_v38 = vcombine.high %v3089_v47, %v3097_v49  ;;  %v3131_v44 = vcombine.high %v3105_v51, %v3113_v53 }
 0x626   :  { %v2376_v54 = vsel %vm1115_vm2, %v4351_v22, -inf  ;;  %v2379_v59 = vsel %vm1115_vm2, %v4357_v46, -inf }
 0x627   :  { %2377 = vmax.xlane.f32.xlu1 %v2376_v54  ;;  %2374 = vmax.xlane.f32.xlu0 %v2373_v39  ;;  %v4364_v58 = vrot.slane %v3114_v56, %v4060_v61  ;;  %v4369_v63 = vrot.slane %v3130_v57, %v4060_v61  ;;  %v3129_v2 = vrot.slane %v3115_v38, %v4060_v61 }
 0x628   :  { %v3145_v60 = vrot.slane %v3131_v44, %v4060_v61 }
 0x629   :  { %v3146_v62 = vcombine.low %v4364_v58, %v4369_v63  ;;  %v3147_v1 = vcombine.high %v4364_v58, %v4369_v63 }
 0x62a   :  { %v3148_v4 = vcombine.low %v3129_v2, %v3145_v60  ;;  %v3149_v6 = vcombine.high %v3129_v2, %v3145_v60 }
 0x62b   :  { %2380 = vmax.xlane.f32.xlu0 %v2379_v59 }
 0x638   :  { %239 = vrot.lane.b32.xlu1 %v4144_v50, %s3968_s1 }
 0x63c   :  { %245 = vrot.lane.b32.xlu1 %v4144_v50, %s3970_s5 }
 0x640   :  { %251 = vrot.lane.b32.xlu1 %v4144_v50, %s3971_s6 }
 0x644   :  { %3256 = vrot.lane.b32.xlu1 %v3901_v0, %s3972_s7 }
 0x648   :  { %3254 = vrot.lane.b32.xlu1 %v3902_v3, %s3972_s7 }
 0x64c   :  { %3228 = vrot.lane.b32.xlu1 %v3148_v4, %s3973_s8 }
 0x650   :  { %3236 = vrot.lane.b32.xlu1 %v3149_v6, %s3974_s9 }
 0x6ac   :  { %v2372_v10 = vpop.xlane.xlu0 %2371 }
 0x6ad   :  { %v2382_v11 = vsub.f32 %v4341_v13, %v2372_v10 }
 0x6af   :  { %v2386_v14 = vmul.f32 1.442695, %v2382_v11 }
 0x6b0   :  { %v2378_v16 = vpop.xlane.xlu1 %2377  ;;  %v2375_v15 = vpop.xlane.xlu0 %2374 }
 0x6b1   :  { %3873 = vpow2.f32 %v2386_v14  ;;  %v2384_v18 = vsub.f32 %v4351_v22, %v2378_v16  ;;  %v2383_v19 = vsub.f32 %v4347_v42, %v2375_v15  ;;  %v3903_v15 = vld [vmem:[#allocation4 + $0x18] sm:$0xff] }
 0x6b3   :  { %v2388_v17 = vmul.f32 1.442695, %v2383_v19  ;;  %v2390_v9 = vmul.f32 1.442695, %v2384_v18 }
 0x6b4   :  { %v2381_v20 = vpop.xlane.xlu0 %2380  ;;  %v240_v19 = vpop.permute.xlu1 %239 }
 0x6b5   :  { %v2385_v21 = vsub.f32 %v4357_v46, %v2381_v20  ;;  %3875 = vpow2.f32 %v2388_v17 }
 0x6b6   :  { %3877 = vpow2.f32 %v2390_v9 }
 0x6b7   :  { %v2392_v12 = vmul.f32 1.442695, %v2385_v21 }
 0x6b9   :  { %3879 = vpow2.f32 %v2392_v12 }
 0x6be   :  { %v3874_v28 = vpop.eup %3873 }
 0x6bf   :  { %v2394_v32 = vsel %vm1115_vm2, %v3874_v28, 0.0 }
 0x6c0   :  { %2395 = vadd.xlane.f32.xlu0 %v2394_v32 }
 0x6c2   :  { %v3876_v7 = vpop.eup %3875 }
 0x6c3   :  { %v2397_v35 = vsel %vm1115_vm2, %v3876_v7, 0.0  ;;  %v3878_v37 = vpop.eup %3877 }
 0x6c4   :  { %2398 = vadd.xlane.f32.xlu0 %v2397_v35  ;;  %v2400_v41 = vsel %vm1115_vm2, %v3878_v37, 0.0 }
 0x6c6   :  { %v3880_v45 = vpop.eup %3879 }
 0x6c7   :  { %v2403_v47 = vsel %vm1115_vm2, %v3880_v45, 0.0 }
 0x6c8   :  { %2401 = vadd.xlane.f32.xlu0 %v2400_v41 }
 0x6cc   :  { %2404 = vadd.xlane.f32.xlu0 %v2403_v47 }
 0x749   :  { %v2396_v49 = vpop.xlane.xlu0 %2395 }
 0x74a   :  { %3881 = vrcp.f32 %v2396_v49 }
 0x74d   :  { %v2399_v51 = vpop.xlane.xlu0 %2398 }
 0x74e   :  { %3883 = vrcp.f32 %v2399_v51 }
 0x751   :  { %v2402_v53 = vpop.xlane.xlu0 %2401 }
 0x752   :  { %3885 = vrcp.f32 %v2402_v53 }
 0x755   :  { %v2405_v54 = vpop.xlane.xlu0 %2404 }
 0x756   :  { %3887 = vrcp.f32 %v2405_v54 }
 0x757   :  { %v3882_v39 = vpop.eup %3881 }
 0x758   :  { %v2407_v56 = vmul.f32 %v3882_v39, %v3874_v28 }
 0x75a   :  { %v2414_v57 = vmul.f32 %v2407_v56, %v4334_v52 }
 0x75b   :  { %v3884_v59 = vpop.eup %3883 }
 0x75c   :  { %v2418_v38 = vsel %vm1115_vm2, %v2414_v57, 0.0  ;;  %v2409_v44 = vmul.f32 %v3884_v59, %v3876_v7 }
 0x75d   :  { %2419 = vadd.xlane.f32.xlu0 %v2418_v38 }
 0x75e   :  { %v4398_v0 = vmul.f32 %v2409_v44, %v4334_v52 }
 0x75f   :  { %v3886_v2 = vpop.eup %3885 }
 0x760   :  { %v2421_v60 = vsel %vm1115_vm2, %v4398_v0, 0.0  ;;  %v2411_v3 = vmul.f32 %v3886_v2, %v3878_v37 }
 0x761   :  { %2422 = vadd.xlane.f32.xlu0 %v2421_v60 }
 0x762   :  { %v2416_v4 = vmul.f32 %v2411_v3, %v4334_v52 }
 0x763   :  { %v3888_v6 = vpop.eup %3887 }
 0x764   :  { %v2424_v10 = vsel %vm1115_vm2, %v2416_v4, 0.0  ;;  %v2413_v11 = vmul.f32 %v3888_v6, %v3880_v45 }
 0x765   :  { %2425 = vadd.xlane.f32.xlu0 %v2424_v10 }
 0x766   :  { %v4405_v14 = vmul.f32 %v2413_v11, %v4334_v52  ;;  %v246_v52 = vpop.permute.xlu1 %245 }
 0x768   :  { %v2427_v16 = vsel %vm1115_vm2, %v4405_v14, 0.0 }
 0x769   :  { %2428 = vadd.xlane.f32.xlu0 %v2427_v16 }
 0x76a   :  { %v252_v28 = vpop.permute.xlu1 %251 }
 0x76b   :  { %v611_v7 = vcombine.low %v240_v19, %v252_v28  ;;  %v612_v35 = vcombine.high %v240_v19, %v252_v28 }
 0x76d   :  { %v619_v45 = vrot.slane %v611_v7, %v4057_v55  ;;  %v626_v47 = vrot.slane %v612_v35, %v4057_v55 }
 0x76e   :  { %v4420_v53 = vpop.permute.xlu1 %3256 }
 0x77f   :  { %233 = vrot.lane.b32.xlu0 %v4144_v50, %s3969_s4 }
 0x783   :  { %3258 = vrot.lane.b32.xlu0 %v3903_v15, %s3972_s7 }
 0x787   :  { %3220 = vrot.lane.b32.xlu0 %v3147_v1, %s3954_s16 }
 0x7e6   :  { %v2420_v18 = vpop.xlane.xlu0 %2419 }
 0x7e7   :  { %v2430_v9 = vadd.f32 1e-13, %v2420_v18 }
 0x7e9   :  { %3889 = vrcp.f32 %v2430_v9  ;;  %v3255_v9 = vpop.permute.xlu1 %3254 }
 0x7ea   :  { %v2423_v17 = vpop.xlane.xlu0 %2422 }
 0x7eb   :  { %v2431_v12 = vadd.f32 1e-13, %v2423_v17 }
 0x7ee   :  { %v2426_v20 = vpop.xlane.xlu0 %2425 }
 0x7ef   :  { %v2432_v21 = vadd.f32 1e-13, %v2426_v20 }
 0x7f1   :  { %3891 = vrcp.f32 %v2432_v21 }
 0x7f2   :  { %v2429_v50 = vpop.xlane.xlu0 %2428  ;;  %3893 = vrcp.f32 %v2431_v12 }
 0x7f3   :  { %v2433_v32 = vadd.f32 1e-13, %v2429_v50 }
 0x7f5   :  { %3895 = vrcp.f32 %v2433_v32 }
 0x7f6   :  { %v234_v37 = vpop.permute.xlu0 %233  ;;  %v3890_v38 = vpop.eup %3889 }
 0x7f7   :  { %v595_v41 = vcombine.low %v234_v37, %v246_v52  ;;  %v596_v1 = vcombine.high %v234_v37, %v246_v52  ;;  %v2435_v19 = vmul.f32 %v3890_v38, %v2414_v57 }
 0x7f9   :  { %v603_v49 = vrot.slane %v595_v41, %v4057_v55  ;;  %v610_v51 = vrot.slane %v596_v1, %v4057_v55 }
 0x7fa   :  { %v3259_v10 = vpop.permute.xlu0 %3258 }
 0x7fb   :  { %v627_v54 = vcombine.low %v603_v49, %v619_v45  ;;  %v628_v39 = vcombine.high %v603_v49, %v619_v45  ;;  %v643_v56 = vcombine.low %v610_v51, %v626_v47  ;;  %v644_v59 = vcombine.high %v610_v51, %v626_v47 }
 0x7fd   :  { %v635_v44 = vrot.slane %v627_v54, %v4060_v61  ;;  %v642_v2 = vrot.slane %v628_v39, %v4060_v61  ;;  %v651_v60 = vrot.slane %v643_v56, %v4060_v61  ;;  %v658_v3 = vrot.slane %v644_v59, %v4060_v61  ;;  %v3229_v59 = vpop.permute.xlu1 %3228 }
 0x7fe   :  { %v3892_v6 = vpop.eup %3891  ;;  %v3221_v45 = vpop.permute.xlu0 %3220 }
 0x7ff   :  { %v1003_v11 = vcombine.low %v635_v44, %v642_v2  ;;  %v3590_v16 = vcombine.high %v635_v44, %v642_v2  ;;  %v1019_v15 = vcombine.low %v651_v60, %v658_v3  ;;  %v3591_v18 = vcombine.high %v651_v60, %v658_v3  ;;  %v3894_v52 = vpop.eup %3893 }
 0x800   :  { %v2439_v17 = vmul.f32 %v3892_v6, %v2416_v4  ;;  %v2437_v57 = vmul.f32 %v3894_v52, %v4398_v0  ;;  %v3242_v38 = vsel %vm1115_vm2, %v3146_v62, %v3221_v45 }
 0x801   :  { %v1010_v20 = vrot.slane %v1003_v11, %v4057_v55  ;;  %v1018_v21 = vrot.slane %v3590_v16, %v4057_v55  ;;  %v1026_v12 = vrot.slane %v1019_v15, %v4057_v55  ;;  %v1034_v28 = vrot.slane %v3591_v18, %v4057_v55  ;;  %v3237_v18 = vpop.permute.xlu1 %3236 }
 0x802   :  { %v3896_v50 = vpop.eup %3895  ;;  %v2546_v32 = vcombine.low %v2435_v19, %v2439_v17  ;;  %v2547_v7 = vcombine.high %v2435_v19, %v2439_v17  ;;  %v3244_v16 = vsel %vm1597_vm3, %v3242_v38, %v3229_v59 }
 0x803   :  { %v1035_v35 = vcombine.low %v1010_v20, %v1018_v21  ;;  %v1051_v37 = vcombine.low %v1026_v12, %v1034_v28  ;;  %v1036_v41 = vcombine.high %v1010_v20, %v1018_v21  ;;  %v1052_v1 = vcombine.high %v1026_v12, %v1034_v28 }
 0x804   :  { %v2441_v4 = vmul.f32 %v3896_v50, %v4405_v14  ;;  %v4441_v14 = vrot.slane %v2546_v32, %v4057_v55  ;;  %v4447_v60 = vrot.slane %v2547_v7, %v4057_v55 }
 0x805   :  { %v1043_v47 = vrot.slane %v1035_v35, %v4060_v61  ;;  %v1059_v49 = vrot.slane %v1051_v37, %v4060_v61  ;;  %v1050_v51 = vrot.slane %v1036_v41, %v4060_v61  ;;  %v1066_v54 = vrot.slane %v1052_v1, %v4060_v61 }
 0x806   :  { %v2562_v39 = vcombine.low %v2437_v57, %v2441_v4  ;;  %v2563_v56 = vcombine.high %v2437_v57, %v2441_v4 }
 0x807   :  { %v1067_v0 = vcombine.low %v1043_v47, %v1059_v49  ;;  %v1068_v44 = vcombine.high %v1043_v47, %v1059_v49  ;;  %v1069_v6 = vcombine.low %v1050_v51, %v1066_v54  ;;  %v1070_v58 = vcombine.high %v1050_v51, %v1066_v54 }
 0x808   :  { %v4444_v2 = vrot.slane %v2562_v39, %v4057_v55  ;;  %v4450_v3 = vrot.slane %v2563_v56, %v4057_v55 }
 0x809   :  { %3760 = vmatpush3.msra.mxu0 %v1067_v0  ;;  %3765 = vmatpush3.msra.mxu1 %v1068_v44 }
 0x80a   :  { %3762 = vmatmul.mubr.msk.f32.vlgmr.msra.gmra.mxu0 %vm1115_vm2, %v2435_v19  ;;  %3767 = vmatmul.mubr.msk.f32.vlgmr.msra.gmra.mxu1 %vm1115_vm2, %v2437_v57  ;;  %v2578_v63 = vcombine.low %v4441_v14, %v4444_v2  ;;  %v2579_v62 = vcombine.high %v4441_v14, %v4444_v2  ;;  %v2594_v11 = vcombine.low %v4447_v60, %v4450_v3 }
 0x80b   :  { %3769 = vmatprep.subr.mxu0 %v3962_v43  ;;  %3774 = vmatprep.subr.mxu1 %v3962_v43  ;;  %v2595_v15 = vcombine.high %v4447_v60, %v4450_v3  ;;  %v3246_v19 = vsel %vm1599_vm4, %v3244_v16, %v3237_v18  ;;  %v2442_v2 = vcombine.low %v4341_v13, %v4351_v22 }
 0x80c   :  { %3770 = vmatpush3.msra.mxu0 %v1069_v6  ;;  %3775 = vmatpush3.msra.mxu1 %v1070_v58  ;;  %v2602_v14 = vrot.slane %v2594_v11, %v4060_v61 }
 0x80d   :  { %3771 = vmatprep.mubr.msk.f32.mxu0 %vm3964_vm1, %v3962_v43  ;;  %3776 = vmatprep.mubr.msk.f32.mxu1 %vm3964_vm1, %v3962_v43 }
 0x80e   :  { %3772 = vmatmul.mubr.msk.f32.vlgmr.msra.gmra.mxu0 %vm1115_vm2, %v2439_v17  ;;  %3777 = vmatmul.mubr.msk.f32.vlgmr.msra.gmra.mxu1 %vm1115_vm2, %v2441_v4 }
 0x80f   :  { %3787 = vmatprep.mubr.msk.f32.mxu0 %vm62_vm0, %v3246_v19  ;;  %3779 = vmatprep.subr.mxu0 %v3259_v10 }
 0x810   :  { %3780 = vmatpush3.msra.mxu0 %v3259_v10 }
 0x811   :  { %3781 = vmatprep.subr.mxu0 %v4420_v53 }
 0x812   :  { %3782 = vmatpush3.msra.mxu0 %v4420_v53 }
 0x813   :  { %3783 = vmatprep.subr.mxu0 %v3255_v9 }
 0x814   :  { %3784 = vmatpush3.msra.mxu0 %v3255_v9 }
 0x8ca   :  { %v2723_v52 = vpop.f32.mrf.mxu0  ;;  %v2796_v20 = vpop.f32.mrf.mxu1 }
 0x8cc   :  { %v3763_v21 = vpop.f32.mrf.mxu0  ;;  %v3768_v12 = vpop.f32.mrf.mxu1 }
 0x8ce   :  { %v2869_v28 = vpop.f32.mrf.mxu0  ;;  %v2942_v17 = vpop.f32.mrf.mxu1 }
 0x8cf   :  { %v3014_v50 = vcombine.low %v2723_v52, %v2869_v28  ;;  %v3015_v32 = vcombine.high %v2723_v52, %v2869_v28  ;;  %v3030_v7 = vcombine.low %v2796_v20, %v2942_v17  ;;  %v3031_v35 = vcombine.high %v2796_v20, %v2942_v17 }
 0x8d0   :  { %v3773_v37 = vpop.f32.mrf.mxu0  ;;  %v3778_v41 = vpop.f32.mrf.mxu1 }
 0x8d1   :  { %v3022_v10 = vrot.slane %v3014_v50, %v4057_v55  ;;  %v3029_v1 = vrot.slane %v3015_v32, %v4057_v55  ;;  %v3038_v53 = vrot.slane %v3030_v7, %v4057_v55  ;;  %v3045_v9 = vrot.slane %v3031_v35, %v4057_v55  ;;  %v3904_v37 = vld [vmem:[#allocation4] sm:$0xff] }
 0x8d3   :  { %v3046_v45 = vcombine.low %v3022_v10, %v3038_v53  ;;  %v3047_v57 = vcombine.high %v3022_v10, %v3038_v53  ;;  %v3062_v4 = vcombine.low %v3029_v1, %v3045_v9  ;;  %v3063_v47 = vcombine.high %v3029_v1, %v3045_v9 }
 0x8d5   :  { %v3054_v49 = vrot.slane %v3046_v45, %v4060_v61  ;;  %v3061_v51 = vrot.slane %v3047_v57, %v4060_v61  ;;  %v3070_v54 = vrot.slane %v3062_v4, %v4060_v61  ;;  %v3077_v39 = vrot.slane %v3063_v47, %v4060_v61 }
 0x8d7   :  { %v3150_v56 = vcombine.low %v3054_v49, %v3061_v51  ;;  %v3620_v59 = vcombine.high %v3054_v49, %v3061_v51  ;;  %v3166_v38 = vcombine.low %v3070_v54, %v3077_v39  ;;  %v3621_v0 = vcombine.high %v3070_v54, %v3077_v39  ;;  %v3905_v54 = vld [vmem:[#allocation2 + $0x8] sm:$0xff] }
 0x8d9   :  { %v3157_v44 = vrot.slane %v3150_v56, %v4057_v55  ;;  %v3165_v6 = vrot.slane %v3620_v59, %v4057_v55  ;;  %v3173_v58 = vrot.slane %v3166_v38, %v4057_v55  ;;  %v3181_v16 = vrot.slane %v3621_v0, %v4057_v55  ;;  %v3906_v56 = vld [vmem:[#allocation2] sm:$0xff] }
 0x8db   :  { %v3183_v18 = vcombine.high %v3157_v44, %v3165_v6  ;;  %v3199_v19 = vcombine.high %v3173_v58, %v3181_v16  ;;  %v3182_v52 = vcombine.low %v3157_v44, %v3165_v6  ;;  %v3198_v20 = vcombine.low %v3173_v58, %v3181_v16 }
 0x8dc   :  { %v4513_v44 = vrot.slane %v1642_v25, %v4060_v61  ;;  %v4523_v58 = vrot.slane %v2578_v63, %v4060_v61  ;;  %v1657_v25 = vrot.slane %v1643_v29, %v4060_v61  ;;  %v1666_v63 = vrot.slane %v1658_v30, %v4060_v61 }
 0x8dd   :  { %v3197_v21 = vrot.slane %v3183_v18, %v4060_v61  ;;  %v3213_v12 = vrot.slane %v3199_v19, %v4060_v61  ;;  %v3190_v28 = vrot.slane %v3182_v52, %v4060_v61  ;;  %v3206_v17 = vrot.slane %v3198_v20, %v4060_v61 }
 0x8de   :  { %v1674_v6 = vcombine.high %v4513_v44, %v3962_v43  ;;  %v2610_v16 = vcombine.high %v4523_v58, %v3962_v43  ;;  %v1675_v18 = vcombine.high %v1657_v25, %v3962_v43  ;;  %v1516_v19 = vcombine.low %v4128_v36, %v4134_v48 }
 0x8df   :  { %v3217_v50 = vcombine.high %v3197_v21, %v3213_v12  ;;  %v3215_v32 = vcombine.high %v3190_v28, %v3206_v17  ;;  %v3214_v7 = vcombine.low %v3190_v28, %v3206_v17  ;;  %v3216_v35 = vcombine.low %v3197_v21, %v3213_v12 }
 0x8e0   :  { %v1676_v24 = vcombine.high %v1666_v63, %v3962_v43  ;;  %v1524_v29 = vrot.slane %v1516_v19, %v4057_v55  ;;  %v1508_v52 = vrot.slane %v1500_v23, %v4057_v55  ;;  %v1673_v30 = vrot.slane %v1659_v34, %v4060_v61 }
 0x8e1   :  { %3238 = vrot.lane.b32.xlu1 %v3217_v50, %s3974_s9  ;;  %3222 = vrot.lane.b32.xlu0 %v3215_v32, %s3954_s16  ;;  %v1517_v50 = vcombine.high %v4128_v36, %v4134_v48  ;;  %v1515_v32 = vrot.slane %v1501_v26, %v4057_v55 }
 0x8e2   :  { %v1532_v20 = vcombine.low %v1508_v52, %v1524_v29  ;;  %v1677_v21 = vcombine.high %v1673_v30, %v3962_v43  ;;  %v1533_v17 = vcombine.high %v1508_v52, %v1524_v29 }
 0x8e3   :  { %v1531_v34 = vrot.slane %v1517_v50, %v4057_v55  ;;  %v49_v50 = vld [vmem:[#allocation4 + $0x20] sm:$0xff] }
 0x8e4   :  { %v4556_v12 = vrot.slane %v1532_v20, %v4060_v61  ;;  %v1547_v27 = vrot.slane %v1533_v17, %v4060_v61  ;;  %v52_v20 = vld [vmem:[#allocation4 + $0x38] sm:$0xff]  ;;  %v50_v17 = vld [vmem:[#allocation4 + $0x28] sm:$0xff] }
 0x8e5   :  { %3230 = vrot.lane.b32.xlu0 %v3216_v35, %s3973_s8  ;;  %v1548_v35 = vcombine.low %v1515_v32, %v1531_v34  ;;  %v1549_v31 = vcombine.high %v1515_v32, %v1531_v34  ;;  %3790 = vmatprep.subr.mxu1 %v52_v20  ;;  %v2450_v34 = vrot.slane %v2442_v2, %v4057_v55  ;;  %v58_v2 = vld [vmem:[#allocation4 + $0x68] sm:$0xff] }
 0x8e6   :  { %v1564_v28 = vcombine.high %v4556_v12, %v3962_v43  ;;  %3791 = vmatpush3.msra.mxu1 %v52_v20  ;;  %v59_v20 = vld [vmem:[#allocation4 + $0x70] sm:$0xff] }
 0x8e7   :  { %v1556_v36 = vrot.slane %v1548_v35, %v4060_v61  ;;  %v1563_v33 = vrot.slane %v1549_v31, %v4060_v61 }
 0x8e9   :  { %3252 = vrot.lane.b32.xlu0 %v3904_v37, %s3972_s7  ;;  %v1566_v48 = vcombine.high %v1556_v36, %v3962_v43  ;;  %v1567_v37 = vcombine.high %v1563_v33, %v3962_v43 }
 0x8ed   :  { %3265 = vrot.lane.b32.xlu0 %v4025_v40, %s3972_s7 }
 0x953   :  { %v3223_v41 = vpop.permute.xlu0 %3222  ;;  %v3239_v45 = vpop.permute.xlu1 %3238 }
 0x954   :  { %v3243_v1 = vsel %vm1115_vm2, %v3214_v7, %v3223_v41  ;;  %v1565_v7 = vcombine.high %v1547_v27, %v3962_v43 }
 0x957   :  { %v3231_v10 = vpop.permute.xlu0 %3230 }
 0x958   :  { %v3245_v53 = vsel %vm1597_vm3, %v3243_v1, %v3231_v10 }
 0x959   :  { %v3247_v57 = vsel %vm1599_vm4, %v3245_v53, %v3239_v45 }
 0x95b   :  { %v3253_v9 = vpop.permute.xlu0 %3252 }
 0x95c   :  { %3785 = vmatprep.subr.mxu0 %v3253_v9 }
 0x95d   :  { %3786 = vmatpush3.msra.mxu0 %v3253_v9 }
 0x95e   :  { %3788 = vmatmul.mubr.msk.f32.vlgmr.msra.gmra.mxu0 %vm62_vm0, %v3247_v57 }
 0x95f   :  { %v3266_v4 = vpop.permute.xlu0 %3265 }
 0xa1e   :  { %v3789_v47 = vpop.f32.mrf.mxu0 }
 0xa1f   :  { %v3346_v49 = vadd.f32 %v3789_v47, %v3266_v4 }
 0xa20   :  { %v3340_v51 = vpop.f32.mrf.mxu0 }
 0xa21   :  { %v4501_v40 = vadd.f32 %v3905_v54, %v3346_v49  ;;  %v3341_v39 = vadd.f32 %v3340_v51, %v3266_v4 }
 0xa23   :  { %v4503_v59 = vadd.f32 %v3906_v56, %v3341_v39  ;;  %v3354_v38 = vsel %vm62_vm0, %v4501_v40, 0.0 }
 0xa24   :  { %3355 = vadd.xlane.f32.xlu0 %v3354_v38 }
 0xa25   :  { %v3351_v0 = vsel %vm62_vm0, %v4503_v59, 0.0 }
 0xa26   :  { %3352 = vadd.xlane.f32.xlu1 %v3351_v0 }
 0xa37   :  { %3377 = vrot.lane.b32.xlu1 %v4010_v8, %s3969_s4 }
 0xa3b   :  { %1679 = vrot.lane.b32.xlu1 %v1674_v6, %s3954_s16 }
 0xa3f   :  { %2615 = vrot.lane.b32.xlu1 %v2610_v16, %s3954_s16 }
 0xa43   :  { %1683 = vrot.lane.b32.xlu1 %v1657_v25, %s3973_s8 }
 0xa47   :  { %1687 = vrot.lane.b32.xlu1 %v1675_v18, %s3974_s9 }
 0xa4b   :  { %1691 = vrot.lane.b32.xlu1 %v1666_v63, %s3972_s7 }
 0xa4f   :  { %1695 = vrot.lane.b32.xlu1 %v1676_v24, %s3971_s6 }
 0xa53   :  { %1699 = vrot.lane.b32.xlu1 %v1673_v30, %s3970_s5 }
 0xa57   :  { %1703 = vrot.lane.b32.xlu1 %v1677_v21, %s3968_s1  ;;  %v51_v21 = vld [vmem:[#allocation4 + $0x30] sm:$0xff] }
 0xa58   :  { %3792 = vmatprep.subr.mxu1 %v51_v21 }
 0xa59   :  { %3793 = vmatpush3.msra.mxu1 %v51_v21 }
 0xa5a   :  { %3794 = vmatprep.subr.mxu1 %v50_v17 }
 0xa5b   :  { %1569 = vrot.lane.b32.xlu1 %v1564_v28, %s3954_s16  ;;  %3795 = vmatpush3.msra.mxu1 %v50_v17 }
 0xa5c   :  { %3796 = vmatprep.subr.mxu1 %v49_v50 }
 0xa5d   :  { %3797 = vmatpush3.msra.mxu1 %v49_v50 }
 0xa5f   :  { %1573 = vrot.lane.b32.xlu1 %v1547_v27, %s3973_s8  ;;  %v2612_v27 = vcombine.high %v2602_v14, %v3962_v43 }
 0xa63   :  { %1577 = vrot.lane.b32.xlu1 %v1565_v7, %s3974_s9  ;;  %v2609_v7 = vrot.slane %v2595_v15, %v4060_v61 }
 0xa67   :  { %1581 = vrot.lane.b32.xlu1 %v1556_v36, %s3972_s7 }
 0xa6b   :  { %1585 = vrot.lane.b32.xlu1 %v1566_v48, %s3971_s6  ;;  %v2613_v48 = vcombine.high %v2609_v7, %v3962_v43 }
 0xa6f   :  { %1589 = vrot.lane.b32.xlu1 %v1563_v33, %s3970_s5 }
 0xa73   :  { %1593 = vrot.lane.b32.xlu1 %v1567_v37, %s3968_s1  ;;  %v2443_v37 = vcombine.high %v4341_v13, %v4351_v22 }
 0xaad   :  { %v3356_v41 = vpop.xlane.xlu0 %3355 }
 0xaae   :  { %v3358_v10 = vmul.f32 0.03125, %v3356_v41 }
 0xaaf   :  { %v3353_v1 = vpop.xlane.xlu1 %3352 }
 0xab0   :  { %v3357_v53 = vmul.f32 0.03125, %v3353_v1  ;;  %v4581_v9 = vsub.f32 %v4501_v40, %v3358_v10  ;;  %v2459_v10 = vcombine.high %v4347_v42, %v4357_v46 }
 0xab2   :  { %v4584_v45 = vsub.f32 %v4503_v59, %v3357_v53  ;;  %v3362_v49 = vmul.f32 %v4581_v9, %v4581_v9 }
 0xab3   :  { %v4586_v57 = vpop.permute.xlu1 %3377 }
 0xab4   :  { %v3361_v4 = vmul.f32 %v4584_v45, %v4584_v45  ;;  %v3366_v54 = vsel %vm62_vm0, %v3362_v49, 0.0  ;;  %v2473_v49 = vrot.slane %v2459_v10, %v4057_v55 }
 0xab6   :  { %v3363_v47 = vsel %vm62_vm0, %v3361_v4, 0.0 }
 0xab7   :  { %3364 = vadd.xlane.f32.xlu0 %v3363_v47  ;;  %v1680_v51 = vpop.permute.xlu1 %1679  ;;  %v2457_v47 = vrot.slane %v2443_v37, %v4057_v55 }
 0xab8   :  { %v1706_v16 = vsel %vm1115_vm2, %v4513_v44, %v1680_v51  ;;  %v2593_v44 = vrot.slane %v2579_v62, %v4060_v61  ;;  %v2458_v62 = vcombine.low %v4347_v42, %v4357_v46 }
 0xab9   :  { %v2490_v51 = vcombine.low %v2457_v47, %v2473_v49 }
 0xaba   :  { %v2466_v11 = vrot.slane %v2458_v62, %v4057_v55 }
 0xabb   :  { %3367 = vadd.xlane.f32.xlu0 %v3366_v54  ;;  %v4594_v39 = vpop.permute.xlu1 %2615  ;;  %v2498_v54 = vrot.slane %v2490_v51, %v4060_v61 }
 0xabc   :  { %v2474_v35 = vcombine.low %v2450_v34, %v2466_v11  ;;  %v2475_v41 = vcombine.high %v2450_v34, %v2466_v11  ;;  %v2642_v50 = vsel %vm1115_vm2, %v4523_v58, %v4594_v39 }
 0xabd   :  { %v2508_v55 = vcombine.high %v2498_v54, %v3962_v43 }
 0xabe   :  { %v4634_v31 = vrot.slane %v2474_v35, %v4060_v61  ;;  %v2489_v4 = vrot.slane %v2475_v41, %v4060_v61 }
 0xabf   :  { %v1684_v56 = vpop.permute.xlu1 %1683 }
 0xac0   :  { %v1707_v25 = vsel %vm1597_vm3, %v1706_v16, %v1684_v56  ;;  %v2506_v15 = vcombine.high %v4634_v31, %v3962_v43  ;;  %v2507_v46 = vcombine.high %v2489_v4, %v3962_v43  ;;  %v2491_v56 = vcombine.high %v2457_v47, %v2473_v49 }
 0xac1   :  { %v3389_v49 = vsub.s32 2, %v4005_v5 }
 0xac3   :  { %v1688_v38 = vpop.permute.xlu1 %1687 }
 0xac4   :  { %v1708_v63 = vsel %vm1599_vm4, %v1707_v25, %v1688_v38  ;;  %v2505_v38 = vrot.slane %v2491_v56, %v4060_v61 }
 0xac7   :  { %v1692_v0 = vpop.permute.xlu1 %1691 }
 0xac8   :  { %v1709_v19 = vsel %vm62_vm0, %v1708_v63, %v1692_v0  ;;  %v2509_v0 = vcombine.high %v2505_v38, %v3962_v43 }
 0xacb   :  { %v1696_v6 = vpop.permute.xlu1 %1695 }
 0xacc   :  { %v1710_v23 = vsel %vm1602_vm5, %v1709_v19, %v1696_v6 }
 0xacf   :  { %v1700_v18 = vpop.permute.xlu1 %1699 }
 0xad0   :  { %v1711_v24 = vsel %vm1604_vm6, %v1710_v23, %v1700_v18 }
 0xad1   :  { %3382 = vrot.lane.b32.xlu0 %v4010_v8, %s3972_s7  ;;  %v2611_v8 = vcombine.high %v2593_v44, %v3962_v43 }
 0xad3   :  { %v1704_v29 = vpop.permute.xlu1 %1703 }
 0xad4   :  { %v1712_v52 = vsel %vm1606_vm7, %v1711_v24, %v1704_v29 }
 0xad5   :  { %2619 = vrot.lane.b32.xlu0 %v2593_v44, %s3973_s8  ;;  %1714 = vrot.lane.b32.xlu1 %v1712_v52, %s3969_s4 }
 0xad7   :  { %v1570_v30 = vpop.permute.xlu1 %1569 }
 0xad8   :  { %v1596_v33 = vsel %vm1115_vm2, %v4556_v12, %v1570_v30 }
 0xad9   :  { %2623 = vrot.lane.b32.xlu0 %v2611_v8, %s3974_s9  ;;  %v60_v8 = vld [vmem:[#allocation4 + $0x78] sm:$0xff] }
 0xada   :  { %3801 = vmatprep.subr.mxu0 %v60_v8 }
 0xadb   :  { %v1574_v28 = vpop.permute.xlu1 %1573  ;;  %3802 = vmatpush3.msra.mxu0 %v60_v8 }
 0xadc   :  { %v1598_v60 = vsel %vm1597_vm3, %v1596_v33, %v1574_v28  ;;  %3803 = vmatprep.subr.mxu0 %v59_v20 }
 0xadd   :  { %2627 = vrot.lane.b32.xlu0 %v2602_v14, %s3972_s7  ;;  %3804 = vmatpush3.msra.mxu0 %v59_v20 }
 0xade   :  { %3805 = vmatprep.subr.mxu0 %v58_v2 }
 0xadf   :  { %v1578_v26 = vpop.permute.xlu1 %1577  ;;  %3806 = vmatpush3.msra.mxu0 %v58_v2 }
 0xae0   :  { %v1600_v1 = vsel %vm1599_vm4, %v1598_v60, %v1578_v26 }
 0xae1   :  { %2631 = vrot.lane.b32.xlu0 %v2612_v27, %s3971_s6 }
 0xae3   :  { %v1582_v32 = vpop.permute.xlu1 %1581 }
 0xae4   :  { %v1601_v53 = vsel %vm62_vm0, %v1600_v1, %v1582_v32 }
 0xae5   :  { %2635 = vrot.lane.b32.xlu0 %v2609_v7, %s3970_s5 }
 0xae7   :  { %v1586_v36 = vpop.permute.xlu1 %1585 }
 0xae8   :  { %v1603_v12 = vsel %vm1602_vm5, %v1601_v53, %v1586_v36 }
 0xae9   :  { %2639 = vrot.lane.b32.xlu0 %v2613_v48, %s3968_s1 }
 0xaeb   :  { %v1590_v3 = vpop.permute.xlu1 %1589 }
 0xaec   :  { %v1605_v13 = vsel %vm1604_vm6, %v1603_v12, %v1590_v3 }
 0xaed   :  { %2511 = vrot.lane.b32.xlu0 %v2506_v15, %s3954_s16 }
 0xaef   :  { %v1594_v22 = vpop.permute.xlu1 %1593 }
 0xaf0   :  { %v1607_v42 = vsel %vm1606_vm7, %v1605_v13, %v1594_v22  ;;  %v55_v13 = vld [vmem:[#allocation4 + $0x50] sm:$0xff]  ;;  %v54_v22 = vld [vmem:[#allocation4 + $0x48] sm:$0xff] }
 0xaf1   :  { %1609 = vst.msk [vmem:[%s4721_s3 + $0x10] sm:$0xf] %vm1608_vm8, %v1607_v42  ;;  %2515 = vrot.lane.b32.xlu0 %v2489_v4, %s3973_s8  ;;  %v53_v4 = vld [vmem:[#allocation4 + $0x40] sm:$0xff] }
 0xaf2   :  { %v3907_v42 = vld [vmem:[#allocation4 + $0x80] sm:$0xf] }
 0xaf5   :  { %2519 = vrot.lane.b32.xlu0 %v2507_v46, %s3974_s9  ;;  %v3390_v46 = vrot.slane %v3907_v42, %v3389_v49 }
 0xaf9   :  { %2523 = vrot.lane.b32.xlu0 %v2498_v54, %s3972_s7 }
 0xafd   :  { %2527 = vrot.lane.b32.xlu0 %v2508_v55, %s3971_s6 }
 0xb01   :  { %2531 = vrot.lane.b32.xlu0 %v2505_v38, %s3970_s5 }
 0xb05   :  { %2535 = vrot.lane.b32.xlu0 %v2509_v0, %s3968_s1 }
 0xb40   :  { %v3365_v6 = vpop.xlane.xlu0 %3364 }
 0xb41   :  { %v3369_v16 = vmul.f32 0.03125, %v3365_v6  ;;  %v3476_v6 = vsub.s32 3, %v4005_v5 }
 0xb43   :  { %v3371_v25 = vadd.f32 1e-05, %v3369_v16  ;;  %v3477_v16 = vrot.slane %v3907_v42, %v3476_v6 }
 0xb44   :  { %v3368_v18 = vpop.xlane.xlu0 %3367 }
 0xb45   :  { %3897 = vrsqrt.f32 %v3371_v25  ;;  %v3370_v63 = vmul.f32 0.03125, %v3368_v18 }
 0xb47   :  { %v3372_v19 = vadd.f32 1e-05, %v3370_v63  ;;  %v1715_v23 = vpop.permute.xlu1 %1714 }
 0xb48   :  { %1718 = vst.msk [vmem:[%s4721_s3 + $0x10] sm:$0xf] %vm1717_vm9, %v1715_v23  ;;  %v3383_v61 = vpop.permute.xlu0 %3382 }
 0xb49   :  { %3899 = vrsqrt.f32 %v3372_v19 }
 0xb4c   :  { %v2620_v24 = vpop.permute.xlu0 %2619 }
 0xb50   :  { %v2624_v43 = vpop.permute.xlu0 %2623 }
 0xb52   :  { %v3898_v29 = vpop.eup %3897 }
 0xb53   :  { %v3375_v44 = vmul.f32 %v3898_v29, %v4584_v45  ;;  %v57_v45 = vld [vmem:[#allocation4 + $0x60] sm:$0xff] }
 0xb54   :  { %v2628_v52 = vpop.permute.xlu0 %2627  ;;  %3807 = vmatprep.subr.mxu0 %v57_v45 }
 0xb55   :  { %v3380_v30 = vmul.f32 %v4586_v57, %v3375_v44  ;;  %3808 = vmatpush3.msra.mxu0 %v57_v45 }
 0xb56   :  { %v3900_v21 = vpop.eup %3899 }
 0xb57   :  { %v3376_v28 = vmul.f32 %v3900_v21, %v4581_v9  ;;  %v3385_v14 = vadd.f32 %v3383_v61, %v3380_v30  ;;  %v2643_v9 = vsel %vm1597_vm3, %v2642_v50, %v2620_v24 }
 0xb58   :  { %v2632_v62 = vpop.permute.xlu0 %2631  ;;  %v2644_v34 = vsel %vm1599_vm4, %v2643_v9, %v2624_v43 }
 0xb59   :  { %v3381_v17 = vmul.f32 %v4586_v57, %v3376_v28  ;;  %3798 = vmatprep.mubr.msk.f32.mxu1 %vm62_vm0, %v3385_v14  ;;  %v2645_v57 = vsel %vm62_vm0, %v2644_v34, %v2628_v52 }
 0xb5a   :  { %v2646_v11 = vsel %vm1602_vm5, %v2645_v57, %v2632_v62 }
 0xb5b   :  { %v3386_v26 = vadd.f32 %v3383_v61, %v3381_v17 }
 0xb5c   :  { %v2636_v27 = vpop.permute.xlu0 %2635 }
 0xb5d   :  { %3799 = vmatmul.mubr.msk.f32.vlgmr.msra.gmra.mxu1 %vm62_vm0, %v3386_v26  ;;  %v2647_v32 = vsel %vm1604_vm6, %v2646_v11, %v2636_v27 }
 0xb60   :  { %v2640_v7 = vpop.permute.xlu0 %2639 }
 0xb61   :  { %v2648_v58 = vsel %vm1606_vm7, %v2647_v32, %v2640_v7 }
 0xb62   :  { %2650 = vrot.lane.b32.xlu0 %v2648_v58, %s3969_s4 }
 0xb64   :  { %v2512_v39 = vpop.permute.xlu0 %2511 }
 0xb65   :  { %v2538_v37 = vsel %vm1115_vm2, %v4634_v31, %v2512_v39  ;;  %v56_v31 = vld [vmem:[#allocation4 + $0x58] sm:$0xff] }
 0xb66   :  { %3809 = vmatprep.subr.mxu0 %v56_v31 }
 0xb67   :  { %3810 = vmatpush3.msra.mxu0 %v56_v31 }
 0xb68   :  { %v2516_v35 = vpop.permute.xlu0 %2515  ;;  %3811 = vmatprep.subr.mxu0 %v55_v13 }
 0xb69   :  { %v2539_v60 = vsel %vm1597_vm3, %v2538_v37, %v2516_v35  ;;  %3812 = vmatpush3.msra.mxu0 %v55_v13 }
 0xb6a   :  { %3813 = vmatprep.subr.mxu0 %v54_v22 }
 0xb6b   :  { %3814 = vmatpush3.msra.mxu0 %v54_v22 }
 0xb6c   :  { %v2520_v36 = vpop.permute.xlu0 %2519  ;;  %3815 = vmatprep.subr.mxu0 %v53_v4 }
 0xb6d   :  { %v2540_v15 = vsel %vm1599_vm4, %v2539_v60, %v2520_v36  ;;  %3816 = vmatpush3.msra.mxu0 %v53_v4 }
 0xb70   :  { %v2524_v48 = vpop.permute.xlu0 %2523 }
 0xb71   :  { %v2541_v41 = vsel %vm62_vm0, %v2540_v15, %v2524_v48 }
 0xb74   :  { %v2528_v33 = vpop.permute.xlu0 %2527 }
 0xb75   :  { %v2542_v10 = vsel %vm1602_vm5, %v2541_v41, %v2528_v33 }
 0xb78   :  { %v2532_v3 = vpop.permute.xlu0 %2531 }
 0xb79   :  { %v2543_v1 = vsel %vm1604_vm6, %v2542_v10, %v2532_v3 }
 0xb7c   :  { %v2536_v53 = vpop.permute.xlu0 %2535 }
 0xb7d   :  { %v2544_v12 = vsel %vm1606_vm7, %v2543_v1, %v2536_v53 }
 0xb7e   :  { %2545 = vst.msk [vmem:[%s4721_s3 + $0x14] sm:$0xf] %vm1608_vm8, %v2544_v12 }
 0xbd4   :  { %v2651_v47 = vpop.permute.xlu0 %2650 }
 0xbd5   :  { %2653 = vst.msk [vmem:[%s4721_s3 + $0x14] sm:$0xf] %vm1717_vm9, %v2651_v47 }
 0xc1d   :  { %v3800_v51 = vpop.f32.mrf.mxu1 }
 0xc1e   :  { %v3469_v54 = vadd.f32 %v3800_v51, %v3390_v46 }
 0xc1f   :  { %v3463_v55 = vpop.f32.mrf.mxu1 }
 0xc20   :  { %v3464_v56 = vadd.f32 %v3463_v55, %v3390_v46  ;;  %v3473_v0 = vmax.f32 %v3469_v54, 0.0 }
 0xc22   :  { %v3472_v38 = vmax.f32 %v3464_v56, 0.0 }
 0xc24   :  { %3817 = vmatprep.mubr.msk.f32.mxu0 %vm3478_vm10, %v3472_v38 }
 0xc25   :  { %3818 = vmatmul.mubr.msk.f32.vlgmr.msra.gmra.mxu0 %vm3478_vm10, %v3473_v0 }
 0xce5   :  { %v3819_v25 = vpop.f32.mrf.mxu0 }
 0xce6   :  { %v3557_v18 = vadd.f32 %v3819_v25, %v3477_v16 }
 0xce7   :  { %v3551_v63 = vpop.f32.mrf.mxu0 }
 0xce8   :  { %v3561_v19 = vadd.f32 %v3557_v18, %v4501_v40  ;;  %v3552_v23 = vadd.f32 %v3551_v63, %v3477_v16 }
 0xcea   :  { %3563 = vst.msk [vmem:[%s4721_s3 + $0x8] sm:$0xff] %vm62_vm0, %v3561_v19  ;;  %v3560_v61 = vadd.f32 %v3552_v23, %v4503_v59 }
 0xcec   :  { %3562 = vst.msk [vmem:[%s4721_s3] sm:$0xff] %vm62_vm0, %v3560_v61 }
 0xced   :  { %3568 = vsyncpa [#allocation3], 1 }
 0xcee   :  { %3569 = vsyncpa [#allocation5], 1 }

</bundles_post_ra>
